<compile_context>
chip_gen: v5e
topology: v5e:2x2
jax: 0.10.0
libtpu: 0.0.40
codegen_flags: <defaults>
</compile_context>

<pallas_src>
import jax
import jax.numpy as jnp
import numpy as np
from jax import lax
from jax.experimental import pallas as pl
from jax.experimental.pallas import tpu as pltpu

_F32 = jnp.float32


# ----------------------------------------------------------------------------
# helpers
# ----------------------------------------------------------------------------
def _round_up(x, m):
    return ((x + m - 1) // m) * m


def _cdiv(a, b):
    return -(-a // b)


def _num_tensorcores():
    """Best-effort TensorCore count of the default device (megacore / v7x)."""
    try:
        kind = jax.devices()[0].device_kind.lower()
    except Exception:
        return 1
    if any(tag in kind for tag in ("v4", "v5p", "v7", "7x")):
        return 2
    return 1


def _choose_tiling(batch, chunk=128, max_tb=512):
    """Pick (padded batch Bp, lanes per grid step TB, lane chunk CH).

    Single-TC chips: fewest grid steps (grid=1 for small batches).
    Multi-TC chips: >=2 and an even number of 'parallel' grid steps.
    """
    bp0 = _round_up(max(int(batch), 1), chunk)
    tb = min(max_tb, bp0)
    steps = _cdiv(bp0, tb)
    if _num_tensorcores() >= 2 and bp0 > chunk:
        if steps < 2:
            steps = 2
        if steps % 2:
            steps += 1
        tb = _round_up(_cdiv(bp0, steps), chunk)
        steps = _cdiv(bp0, tb)
        if steps % 2:
            steps += 1
    bp = steps * tb
    return bp, tb, chunk


def _recip(x):
    # EUP reciprocal + one Newton step: moves the bulk of the divide off the
    # saturating VALU slot while keeping ~1-ulp f32 accuracy.
    r = pl.reciprocal(x, approx=True)
    return r * (2.0 - x * r)


# ----------------------------------------------------------------------------
# kernel
# ----------------------------------------------------------------------------
def _gcn_wmmse_kernel(taps_ref, h2_ref, inv_ref, v_ref,
                      out_v_ref, out_uw_ref, cov_scr):
    """taps_ref: SMEM (6, C) f32      [ar_r, ar_i, dl_r, dl_i, rc_r, rc_i]
    h2_ref:    VMEM (NCB, K, K, CH)   |H|^2, chunk-major
    inv_ref:   VMEM (NCB, 5, K, CH)   [Re diagH, Im diagH, noise, sqrt(pmax),
                                       rsqrt(pmax)]   (layer-invariant)
    v_ref:     VMEM (NCB, 2, K, CH)   [Re v, Im v]    (round-trips per layer)
    out_v_ref: VMEM (NCB, 2, K, CH)   [Re v, Im v]
    out_uw_ref:VMEM (NCB, 4, K, CH)   [Re u, Im u, Re w, Im w]
    cov_scr:   VMEM (K, CH) scratch for the cov row reduce."""
    ncb = h2_ref.shape[0]
    k = h2_ref.shape[1]
    c_taps = taps_ref.shape[1]

    # Filter taps: SMEM scalars, read once per grid step, reused by all chunks.
    taps = [tuple(taps_ref[r, c] for r in range(6)) for c in range(c_taps)]

    # Lane-chunk loop: decouples the (large, contiguous) DMA block from the
    # compute width so each chunk's intermediates stay ~1 vreg each.
    for c in range(ncb):
        hdr = inv_ref[c, 0]            # (K, CH) Re diag(H)
        hdi = inv_ref[c, 1]            # Im diag(H)
        noise = inv_ref[c, 2]
        sq_pmax = inv_ref[c, 3]        # sqrt(pmax)
        rs_pmax = inv_ref[c, 4]        # rsqrt(pmax)
        vr = v_ref[c, 0]
        vi = v_ref[c, 1]

        # ---------------- u step ----------------
        utr = hdr * vr - hdi * vi      # u_tilde = diag(H) * v
        uti = hdr * vi + hdi * vr
        vsq = vr * vr + vi * vi
        # cov[i] = sum_j |H[i,j]|^2 |v[j]|^2 : per-row XLU reduce staged
        # through a VMEM scratch row (no vreg-resident partials / concat).
        for i in range(k):
            cov_scr[pl.ds(i, 1)] = jnp.sum(h2_ref[c, i] * vsq, axis=0,
                                           keepdims=True)
        cov = cov_scr[...] + noise
        inv_cov = _recip(cov)
        ur = utr * inv_cov
        ui = uti * inv_cov
        out_uw_ref[c, 0] = ur          # store u as soon as it is final
        out_uw_ref[c, 1] = ui

        # ---------------- w step ----------------
        # error = 1 - conj(u) * u_tilde ; w = 1/error = conj(error)/|error|^2
        er = 1.0 - (ur * utr + ui * uti)
        eip = ur * uti - ui * utr      # = -Im(error)
        ed = er * er + eip * eip
        inv_ed = _recip(ed)
        wr = er * inv_ed
        wi = eip * inv_ed
        out_uw_ref[c, 2] = wr          # store w as soon as it is final
        out_uw_ref[c, 3] = wi
        # TODO(synk): w_poly (matpoly_simple_norm) branch is inactive in the
        # default config and not implemented.

        # ---------------- v step ----------------
        tr = hdr * ur + hdi * ui       # conj(diag(H)) * u
        ti = hdr * ui - hdi * ur
        vtr = tr * wr - ti * wi        # v_tilde
        vti = tr * wi + ti * wr
        abs_w = lax.rsqrt(ed)          # |w| = 1/|error|   (EUP)
        ulc = (ur * ur + ui * ui) * abs_w
        # ulcov[i] = sum_j |H[j,i]|^2 ulc[j] : broadcast-MAC, no transpose.
        ulcov = jnp.zeros_like(noise)
        for j in range(k):
            ulcov = ulcov + h2_ref[c, j] * ulc[j:j + 1, :]
        vtabs = jnp.sqrt(vtr * vtr + vti * vti)
        mu = jnp.maximum(vtabs * rs_pmax - ulcov, 0.0)
        inv_aug = _recip(ulcov + mu)

        # Channel lift (ar + diagload) + complex ReLU + recombination, with
        # the ar/ulaug product folded into one complex scalar per channel:
        #   t_c = v_tilde * (ar_c / ulaug + dl_c)
        vnr = jnp.zeros_like(vr)
        vni = jnp.zeros_like(vr)
        for (ar_r, ar_i, dl_r, dl_i, rc_r, rc_i) in taps:
            g_r = ar_r * inv_aug + dl_r
            g_i = ar_i * inv_aug + dl_i
            t_r = jnp.maximum(vtr * g_r - vti * g_i, 0.0)   # complex ReLU
            t_i = jnp.maximum(vtr * g_i + vti * g_r, 0.0)
            vnr = vnr + (t_r * rc_r - t_i * rc_i)
            vni = vni + (t_r * rc_i + t_i * rc_r)

        # max-power correction: corr = min(sqrt(pmax)/|v|, 1)
        vnsq = vnr * vnr + vni * vni
        corr = jnp.minimum(sq_pmax * lax.rsqrt(vnsq), 1.0)
        out_v_ref[c, 0] = vnr * corr
        out_v_ref[c, 1] = vni * corr


# ----------------------------------------------------------------------------
# packing (layer-invariant packing is done ONCE; only v round-trips per layer)
# ----------------------------------------------------------------------------
def pack_gcn_wmmse_taps(v_param_ar, v_param_diagload, v_param_recomb):
    ar = jnp.asarray(v_param_ar).reshape(-1)
    dl = jnp.asarray(v_param_diagload).reshape(-1)
    rc = jnp.asarray(v_param_recomb).reshape(-1)
    return jnp.stack([jnp.real(ar), jnp.imag(ar),
                      jnp.real(dl), jnp.imag(dl),
                      jnp.real(rc), jnp.imag(rc)], axis=0).astype(_F32)


def pack_gcn_wmmse_invariants(channel_mat, user_noise_pow, bss_maxpow,
                              bp, chunk):
    """Layer-invariant operands packed once into the kernel's lane-dense,
    chunk-major layout: h2 (NC,K,K,CH) and inv (NC,5,K,CH)."""
    b, k, _ = channel_mat.shape
    pad = bp - b
    if pad:
        # Padded lanes get identity channel / unit powers so the math stays
        # finite; their outputs are sliced away on unpack.
        eye = jnp.broadcast_to(jnp.eye(k, dtype=channel_mat.dtype),
                               (pad, k, k))
        channel_mat = jnp.concatenate([channel_mat, eye], axis=0)
        user_noise_pow = jnp.concatenate(
            [user_noise_pow, jnp.ones((pad, k), user_noise_pow.dtype)], axis=0)
        bss_maxpow = jnp.concatenate(
            [bss_maxpow, jnp.ones((pad, k), bss_maxpow.dtype)], axis=0)
    nc = bp // chunk
    hr = jnp.real(channel_mat).astype(_F32)
    hi = jnp.imag(channel_mat).astype(_F32)
    h2 = (hr * hr + hi * hi).reshape(nc, chunk, k, k).transpose(0, 2, 3, 1)
    hd = jnp.diagonal(channel_mat, axis1=-2, axis2=-1)          # (bp, k)
    pmax = bss_maxpow.astype(_F32)
    spmax = jnp.sqrt(pmax)
    planes = jnp.stack([
        jnp.real(hd).astype(_F32),
        jnp.imag(hd).astype(_F32),
        user_noise_pow.astype(_F32),
        spmax,
        1.0 / spmax,
    ], axis=0)                                                   # (5, bp, k)
    inv = planes.reshape(5, nc, chunk, k).transpose(1, 0, 3, 2)  # (nc,5,k,ch)
    return h2, inv


def pack_gcn_wmmse_v(v_in, bp, chunk):
    v = v_in[..., 0] if v_in.ndim == 3 else v_in                 # (b, k)
    b, k = v.shape
    pad = bp - b
    if pad:
        v = jnp.concatenate([v, jnp.ones((pad, k), v.dtype)], axis=0)
    nc = bp // chunk
    planes = jnp.stack([jnp.real(v).astype(_F32),
                        jnp.imag(v).astype(_F32)], axis=0)       # (2, bp, k)
    return planes.reshape(2, nc, chunk, k).transpose(1, 0, 3, 2)  # (nc,2,k,ch)


def unpack_gcn_wmmse_planes(packed, batch):
    """(NC, P, K, CH) real/imag plane pairs -> (batch, K, 1) complex arrays."""
    nc, p, k, ch = packed.shape
    x = packed.transpose(0, 3, 2, 1).reshape(nc * ch, k, p)[:batch]
    out = [(x[..., q] + 1j * x[..., q + 1])[..., None] for q in range(0, p, 2)]
    return out[0] if len(out) == 1 else tuple(out)


# ----------------------------------------------------------------------------
# pallas layer (packed interface) + compatibility wrapper
# ----------------------------------------------------------------------------
def gcn_wmmse_layer_packed(taps, h2, inv, v_packed, *, chunks_per_step):
    nc, k, _, ch = h2.shape
    ncb = chunks_per_step
    grid = nc // ncb
    out_v, out_uw = pl.pallas_call(
        _gcn_wmmse_kernel,
        out_shape=(jax.ShapeDtypeStruct((nc, 2, k, ch), _F32),
                   jax.ShapeDtypeStruct((nc, 4, k, ch), _F32)),
        grid=(grid,),
        in_specs=[
            pl.BlockSpec(memory_space=pltpu.MemorySpace.SMEM),      # taps
            pl.BlockSpec((ncb, k, k, ch), lambda b: (b, 0, 0, 0)),  # |H|^2
            pl.BlockSpec((ncb, 5, k, ch), lambda b: (b, 0, 0, 0)),  # invariants
            pl.BlockSpec((ncb, 2, k, ch), lambda b: (b, 0, 0, 0)),  # v
        ],
        out_specs=(
            pl.BlockSpec((ncb, 2, k, ch), lambda b: (b, 0, 0, 0)),  # v_out
            pl.BlockSpec((ncb, 4, k, ch), lambda b: (b, 0, 0, 0)),  # u, w
        ),
        scratch_shapes=[pltpu.VMEM((k, ch), _F32)],
        compiler_params=pltpu.CompilerParams(
            dimension_semantics=("parallel",)),
    )(taps, h2, inv, v_packed)
    return out_v, out_uw


def gcn_wmmse_layer_siso_adhoc(channel_mat, user_noise_pow, bss_maxpow, v_in,
                               v_param_ar, v_param_diagload, v_param_recomb,
                               v_bypass_in=()):
    """channel_mat (B,K,K) complex, user_noise_pow/bss_maxpow (B,K) real,
    v_in (B,K,1) complex.  Returns (v_out, u_out, w_out, v_bypass_out).

    For multi-layer WMMSE stacks, call pack_gcn_wmmse_invariants /
    pack_gcn_wmmse_taps once and chain gcn_wmmse_layer_packed on the packed v
    so only v round-trips through HBM re-marshaling per layer."""
    b, k, _ = channel_mat.shape
    bp, tb, ch = _choose_tiling(b)
    taps = pack_gcn_wmmse_taps(v_param_ar, v_param_diagload, v_param_recomb)
    h2, inv = pack_gcn_wmmse_invariants(channel_mat, user_noise_pow,
                                        bss_maxpow, bp, ch)
    v_packed = pack_gcn_wmmse_v(v_in, bp, ch)
    out_v, out_uw = gcn_wmmse_layer_packed(taps, h2, inv, v_packed,
                                           chunks_per_step=tb // ch)
    v_out = unpack_gcn_wmmse_planes(out_v, b)
    u_out, w_out = unpack_gcn_wmmse_planes(out_uw, b)
    # TODO(synk): bias / biasnorm / v_bypass branches are inactive in the
    # default config and not implemented.
    v_bypass_out = 0
    return v_out, u_out, w_out, v_bypass_out


# ----------------------------------------------------------------------------
# pure-JAX reference + self-test
# ----------------------------------------------------------------------------
def _reference(channel_mat, user_noise_pow, bss_maxpow, v_in, ar, dl, rc):
    """Pure-JAX (complex64) reference mirroring the torch forward."""
    diag = jnp.diagonal(channel_mat, axis1=-2, axis2=-1)[..., None]   # (B,K,1)
    h2 = jnp.abs(channel_mat) ** 2
    # u step
    u_tilde = diag * v_in
    cov = jnp.matmul(h2, jnp.abs(v_in) ** 2) + user_noise_pow[..., None]
    u = u_tilde / cov
    # w step
    error = 1.0 - jnp.conj(u) * diag * v_in
    w = 1.0 / error
    # v step
    v_tilde = jnp.conj(diag) * u * w
    ulc = jnp.abs(u) ** 2 * jnp.abs(w)
    ulcov = jnp.abs(jnp.matmul(jnp.swapaxes(h2, -2, -1), ulc))
    mu = jnp.maximum(jnp.abs(v_tilde) / jnp.sqrt(bss_maxpow)[..., None]
                     - ulcov, 0.0)
    ulaug = ulcov + mu
    vt = (v_tilde / ulaug)[..., None] * ar + v_tilde[..., None] * dl  # (B,K,1,C)
    vt = jnp.maximum(vt.real, 0.0) + 1j * jnp.maximum(vt.imag, 0.0)
    v = jnp.matmul(vt, rc)[..., 0]                                    # (B,K,1)
    cur = jnp.maximum(bss_maxpow[..., None], jnp.abs(v) ** 2)
    corr = jnp.minimum(jnp.sqrt(bss_maxpow[..., None] / cur), 1.0)
    return v * corr, u, w


def _randcn(key, shape):
    kr, ki = jax.random.split(key)
    return (jax.random.normal(kr, shape)
            + 1j * jax.random.normal(ki, shape)) / jnp.sqrt(2.0)


if __name__ == "__main__":
    B, K, C = 256, 8, 4  # batch, users (SISO adhoc), v_num_channels
    keys = jax.random.split(jax.random.PRNGKey(0), 8)

    # deterministic synthetic parameters (shapes from the module __init__)
    v_param_ar = _randcn(keys[0], (1, C)) / jnp.sqrt(C + 1.0)
    v_param_diagload = _randcn(keys[1], (1, C)) / jnp.sqrt(C + 1.0)
    v_param_recomb = _randcn(keys[2], (C, 1)) / jnp.sqrt(C + 1.0)

    # deterministic synthetic inputs
    channel_mat = _randcn(keys[3], (B, K, K))
    user_noise_pow = 0.1 + jax.random.uniform(keys[4], (B, K))
    bss_maxpow = 1.0 + jax.random.uniform(keys[5], (B, K))
    v_in = 0.3 * _randcn(keys[6], (B, K, 1))

    v_out, u_out, w_out, v_byp = gcn_wmmse_layer_siso_adhoc(
        channel_mat, user_noise_pow, bss_maxpow, v_in,
        v_param_ar, v_param_diagload, v_param_recomb)
    jax.block_until_ready((v_out, u_out, w_out))

    v_ref, u_ref, w_ref = _reference(
        channel_mat, user_noise_pow, bss_maxpow, v_in,
        v_param_ar, v_param_diagload, v_param_recomb)

    ok = (np.allclose(np.asarray(v_out), np.asarray(v_ref), rtol=2e-3, atol=2e-4)
          and np.allclose(np.asarray(u_out), np.asarray(u_ref), rtol=2e-3, atol=2e-4)
          and np.allclose(np.asarray(w_out), np.asarray(w_ref), rtol=2e-3, atol=2e-4))
    if not ok:
        raise RuntimeError("Pallas kernel does not match JAX reference")
    print("KERNEL_OK")
</pallas_src>

<mosaic_0001>
module attributes {stable_mosaic.version = 11 : i64} {
  func.func @_gcn_wmmse_kernel(%arg0: i32, %arg1: memref<6x4xf32, #tpu.memory_space<smem>>, %arg2: memref<2x8x8x128xf32, #tpu.memory_space<vmem>>, %arg3: memref<2x5x8x128xf32, #tpu.memory_space<vmem>>, %arg4: memref<2x2x8x128xf32, #tpu.memory_space<vmem>>, %arg5: memref<2x2x8x128xf32, #tpu.memory_space<vmem>>, %arg6: memref<2x4x8x128xf32, #tpu.memory_space<vmem>>, %arg7: memref<8x128xf32, #tpu.memory_space<vmem>>) attributes {dimension_semantics = [#tpu.dimension_semantics<parallel>], iteration_bounds = array<i64: 1>, scalar_prefetch = 0 : i64, scratch_operands = 1 : i64, tpu.core_type = #tpu.core_type<tc>, window_params = [{transform_indices = @transform_0, window_bounds = array<i64: 6, 4>}, {transform_indices = @transform_1, window_bounds = array<i64: 2, 8, 8, 128>}, {transform_indices = @transform_2, window_bounds = array<i64: 2, 5, 8, 128>}, {transform_indices = @transform_3, window_bounds = array<i64: 2, 2, 8, 128>}, {transform_indices = @transform_4, window_bounds = array<i64: 2, 2, 8, 128>}, {transform_indices = @transform_5, window_bounds = array<i64: 2, 4, 8, 128>}]} {
    %c0 = arith.constant 0 : index
    %c0_0 = arith.constant 0 : index
    %0 = memref.load %arg1[%c0, %c0_0] : memref<6x4xf32, #tpu.memory_space<smem>>
    %c1 = arith.constant 1 : index
    %c0_1 = arith.constant 0 : index
    %1 = memref.load %arg1[%c1, %c0_1] : memref<6x4xf32, #tpu.memory_space<smem>>
    %c2 = arith.constant 2 : index
    %c0_2 = arith.constant 0 : index
    %2 = memref.load %arg1[%c2, %c0_2] : memref<6x4xf32, #tpu.memory_space<smem>>
    %c3 = arith.constant 3 : index
    %c0_3 = arith.constant 0 : index
    %3 = memref.load %arg1[%c3, %c0_3] : memref<6x4xf32, #tpu.memory_space<smem>>
    %c4 = arith.constant 4 : index
    %c0_4 = arith.constant 0 : index
    %4 = memref.load %arg1[%c4, %c0_4] : memref<6x4xf32, #tpu.memory_space<smem>>
    %c5 = arith.constant 5 : index
    %c0_5 = arith.constant 0 : index
    %5 = memref.load %arg1[%c5, %c0_5] : memref<6x4xf32, #tpu.memory_space<smem>>
    %c0_6 = arith.constant 0 : index
    %c1_7 = arith.constant 1 : index
    %6 = memref.load %arg1[%c0_6, %c1_7] : memref<6x4xf32, #tpu.memory_space<smem>>
    %c1_8 = arith.constant 1 : index
    %c1_9 = arith.constant 1 : index
    %7 = memref.load %arg1[%c1_8, %c1_9] : memref<6x4xf32, #tpu.memory_space<smem>>
    %c2_10 = arith.constant 2 : index
    %c1_11 = arith.constant 1 : index
    %8 = memref.load %arg1[%c2_10, %c1_11] : memref<6x4xf32, #tpu.memory_space<smem>>
    %c3_12 = arith.constant 3 : index
    %c1_13 = arith.constant 1 : index
    %9 = memref.load %arg1[%c3_12, %c1_13] : memref<6x4xf32, #tpu.memory_space<smem>>
    %c4_14 = arith.constant 4 : index
    %c1_15 = arith.constant 1 : index
    %10 = memref.load %arg1[%c4_14, %c1_15] : memref<6x4xf32, #tpu.memory_space<smem>>
    %c5_16 = arith.constant 5 : index
    %c1_17 = arith.constant 1 : index
    %11 = memref.load %arg1[%c5_16, %c1_17] : memref<6x4xf32, #tpu.memory_space<smem>>
    %c0_18 = arith.constant 0 : index
    %c2_19 = arith.constant 2 : index
    %12 = memref.load %arg1[%c0_18, %c2_19] : memref<6x4xf32, #tpu.memory_space<smem>>
    %c1_20 = arith.constant 1 : index
    %c2_21 = arith.constant 2 : index
    %13 = memref.load %arg1[%c1_20, %c2_21] : memref<6x4xf32, #tpu.memory_space<smem>>
    %c2_22 = arith.constant 2 : index
    %c2_23 = arith.constant 2 : index
    %14 = memref.load %arg1[%c2_22, %c2_23] : memref<6x4xf32, #tpu.memory_space<smem>>
    %c3_24 = arith.constant 3 : index
    %c2_25 = arith.constant 2 : index
    %15 = memref.load %arg1[%c3_24, %c2_25] : memref<6x4xf32, #tpu.memory_space<smem>>
    %c4_26 = arith.constant 4 : index
    %c2_27 = arith.constant 2 : index
    %16 = memref.load %arg1[%c4_26, %c2_27] : memref<6x4xf32, #tpu.memory_space<smem>>
    %c5_28 = arith.constant 5 : index
    %c2_29 = arith.constant 2 : index
    %17 = memref.load %arg1[%c5_28, %c2_29] : memref<6x4xf32, #tpu.memory_space<smem>>
    %c0_30 = arith.constant 0 : index
    %c3_31 = arith.constant 3 : index
    %18 = memref.load %arg1[%c0_30, %c3_31] : memref<6x4xf32, #tpu.memory_space<smem>>
    %c1_32 = arith.constant 1 : index
    %c3_33 = arith.constant 3 : index
    %19 = memref.load %arg1[%c1_32, %c3_33] : memref<6x4xf32, #tpu.memory_space<smem>>
    %c2_34 = arith.constant 2 : index
    %c3_35 = arith.constant 3 : index
    %20 = memref.load %arg1[%c2_34, %c3_35] : memref<6x4xf32, #tpu.memory_space<smem>>
    %c3_36 = arith.constant 3 : index
    %c3_37 = arith.constant 3 : index
    %21 = memref.load %arg1[%c3_36, %c3_37] : memref<6x4xf32, #tpu.memory_space<smem>>
    %c4_38 = arith.constant 4 : index
    %c3_39 = arith.constant 3 : index
    %22 = memref.load %arg1[%c4_38, %c3_39] : memref<6x4xf32, #tpu.memory_space<smem>>
    %c5_40 = arith.constant 5 : index
    %c3_41 = arith.constant 3 : index
    %23 = memref.load %arg1[%c5_40, %c3_41] : memref<6x4xf32, #tpu.memory_space<smem>>
    %c0_42 = arith.constant 0 : index
    %c0_43 = arith.constant 0 : index
    %c0_44 = arith.constant 0 : index
    %c0_45 = arith.constant 0 : index
    %24 = vector.load %arg3[%c0_42, %c0_43, %c0_44, %c0_45] : memref<2x5x8x128xf32, #tpu.memory_space<vmem>>, vector<1x1x8x128xf32>
    %25 = vector.shape_cast %24 : vector<1x1x8x128xf32> to vector<8x128xf32>
    %c0_46 = arith.constant 0 : index
    %c1_47 = arith.constant 1 : index
    %c0_48 = arith.constant 0 : index
    %c0_49 = arith.constant 0 : index
    %26 = vector.load %arg3[%c0_46, %c1_47, %c0_48, %c0_49] : memref<2x5x8x128xf32, #tpu.memory_space<vmem>>, vector<1x1x8x128xf32>
    %27 = vector.shape_cast %26 : vector<1x1x8x128xf32> to vector<8x128xf32>
    %c0_50 = arith.constant 0 : index
    %c2_51 = arith.constant 2 : index
    %c0_52 = arith.constant 0 : index
    %c0_53 = arith.constant 0 : index
    %28 = vector.load %arg3[%c0_50, %c2_51, %c0_52, %c0_53] : memref<2x5x8x128xf32, #tpu.memory_space<vmem>>, vector<1x1x8x128xf32>
    %29 = vector.shape_cast %28 : vector<1x1x8x128xf32> to vector<8x128xf32>
    %c0_54 = arith.constant 0 : index
    %c3_55 = arith.constant 3 : index
    %c0_56 = arith.constant 0 : index
    %c0_57 = arith.constant 0 : index
    %30 = vector.load %arg3[%c0_54, %c3_55, %c0_56, %c0_57] : memref<2x5x8x128xf32, #tpu.memory_space<vmem>>, vector<1x1x8x128xf32>
    %31 = vector.shape_cast %30 : vector<1x1x8x128xf32> to vector<8x128xf32>
    %c0_58 = arith.constant 0 : index
    %c4_59 = arith.constant 4 : index
    %c0_60 = arith.constant 0 : index
    %c0_61 = arith.constant 0 : index
    %32 = vector.load %arg3[%c0_58, %c4_59, %c0_60, %c0_61] : memref<2x5x8x128xf32, #tpu.memory_space<vmem>>, vector<1x1x8x128xf32>
    %33 = vector.shape_cast %32 : vector<1x1x8x128xf32> to vector<8x128xf32>
    %c0_62 = arith.constant 0 : index
    %c0_63 = arith.constant 0 : index
    %c0_64 = arith.constant 0 : index
    %c0_65 = arith.constant 0 : index
    %34 = vector.load %arg4[%c0_62, %c0_63, %c0_64, %c0_65] : memref<2x2x8x128xf32, #tpu.memory_space<vmem>>, vector<1x1x8x128xf32>
    %35 = vector.shape_cast %34 : vector<1x1x8x128xf32> to vector<8x128xf32>
    %c0_66 = arith.constant 0 : index
    %c1_67 = arith.constant 1 : index
    %c0_68 = arith.constant 0 : index
    %c0_69 = arith.constant 0 : index
    %36 = vector.load %arg4[%c0_66, %c1_67, %c0_68, %c0_69] : memref<2x2x8x128xf32, #tpu.memory_space<vmem>>, vector<1x1x8x128xf32>
    %37 = vector.shape_cast %36 : vector<1x1x8x128xf32> to vector<8x128xf32>
    %38 = arith.mulf %25, %35 : vector<8x128xf32>
    %39 = arith.mulf %27, %37 : vector<8x128xf32>
    %40 = arith.subf %38, %39 : vector<8x128xf32>
    %41 = arith.mulf %25, %37 : vector<8x128xf32>
    %42 = arith.mulf %27, %35 : vector<8x128xf32>
    %43 = arith.addf %41, %42 : vector<8x128xf32>
    %44 = arith.mulf %35, %35 : vector<8x128xf32>
    %45 = arith.mulf %37, %37 : vector<8x128xf32>
    %46 = arith.addf %44, %45 : vector<8x128xf32>
    %c0_70 = arith.constant 0 : index
    %c0_71 = arith.constant 0 : index
    %c0_72 = arith.constant 0 : index
    %c0_73 = arith.constant 0 : index
    %47 = vector.load %arg2[%c0_70, %c0_71, %c0_72, %c0_73] : memref<2x8x8x128xf32, #tpu.memory_space<vmem>>, vector<1x1x8x128xf32>
    %48 = vector.shape_cast %47 : vector<1x1x8x128xf32> to vector<8x128xf32>
    %49 = arith.mulf %48, %46 : vector<8x128xf32>
    %cst = arith.constant dense<0.000000e+00> : vector<128xf32>
    %50 = vector.multi_reduction <add>, %49, %cst [0] : vector<8x128xf32> to vector<128xf32>
    %51 = vector.shape_cast %50 : vector<128xf32> to vector<1x128xf32>
    %c0_74 = arith.constant 0 : index
    %c0_75 = arith.constant 0 : index
    %52 = vector.load %arg7[%c0_74, %c0_75] : memref<8x128xf32, #tpu.memory_space<vmem>>, vector<1x128xf32>
    tpu.vector_store %arg7[%c0_74, %c0_75], %51 {strides = array<i32>} : memref<8x128xf32, #tpu.memory_space<vmem>>, vector<1x128xf32>,
    %c0_76 = arith.constant 0 : index
    %c1_77 = arith.constant 1 : index
    %c0_78 = arith.constant 0 : index
    %c0_79 = arith.constant 0 : index
    %53 = vector.load %arg2[%c0_76, %c1_77, %c0_78, %c0_79] : memref<2x8x8x128xf32, #tpu.memory_space<vmem>>, vector<1x1x8x128xf32>
    %54 = vector.shape_cast %53 : vector<1x1x8x128xf32> to vector<8x128xf32>
    %55 = arith.mulf %54, %46 : vector<8x128xf32>
    %cst_80 = arith.constant dense<0.000000e+00> : vector<128xf32>
    %56 = vector.multi_reduction <add>, %55, %cst_80 [0] : vector<8x128xf32> to vector<128xf32>
    %57 = vector.shape_cast %56 : vector<128xf32> to vector<1x128xf32>
    %c1_81 = arith.constant 1 : index
    %c0_82 = arith.constant 0 : index
    %58 = vector.load %arg7[%c1_81, %c0_82] : memref<8x128xf32, #tpu.memory_space<vmem>>, vector<1x128xf32>
    tpu.vector_store %arg7[%c1_81, %c0_82], %57 {strides = array<i32>} : memref<8x128xf32, #tpu.memory_space<vmem>>, vector<1x128xf32>,
    %c0_83 = arith.constant 0 : index
    %c2_84 = arith.constant 2 : index
    %c0_85 = arith.constant 0 : index
    %c0_86 = arith.constant 0 : index
    %59 = vector.load %arg2[%c0_83, %c2_84, %c0_85, %c0_86] : memref<2x8x8x128xf32, #tpu.memory_space<vmem>>, vector<1x1x8x128xf32>
    %60 = vector.shape_cast %59 : vector<1x1x8x128xf32> to vector<8x128xf32>
    %61 = arith.mulf %60, %46 : vector<8x128xf32>
    %cst_87 = arith.constant dense<0.000000e+00> : vector<128xf32>
    %62 = vector.multi_reduction <add>, %61, %cst_87 [0] : vector<8x128xf32> to vector<128xf32>
    %63 = vector.shape_cast %62 : vector<128xf32> to vector<1x128xf32>
    %c2_88 = arith.constant 2 : index
    %c0_89 = arith.constant 0 : index
    %64 = vector.load %arg7[%c2_88, %c0_89] : memref<8x128xf32, #tpu.memory_space<vmem>>, vector<1x128xf32>
    tpu.vector_store %arg7[%c2_88, %c0_89], %63 {strides = array<i32>} : memref<8x128xf32, #tpu.memory_space<vmem>>, vector<1x128xf32>,
    %c0_90 = arith.constant 0 : index
    %c3_91 = arith.constant 3 : index
    %c0_92 = arith.constant 0 : index
    %c0_93 = arith.constant 0 : index
    %65 = vector.load %arg2[%c0_90, %c3_91, %c0_92, %c0_93] : memref<2x8x8x128xf32, #tpu.memory_space<vmem>>, vector<1x1x8x128xf32>
    %66 = vector.shape_cast %65 : vector<1x1x8x128xf32> to vector<8x128xf32>
    %67 = arith.mulf %66, %46 : vector<8x128xf32>
    %cst_94 = arith.constant dense<0.000000e+00> : vector<128xf32>
    %68 = vector.multi_reduction <add>, %67, %cst_94 [0] : vector<8x128xf32> to vector<128xf32>
    %69 = vector.shape_cast %68 : vector<128xf32> to vector<1x128xf32>
    %c3_95 = arith.constant 3 : index
    %c0_96 = arith.constant 0 : index
    %70 = vector.load %arg7[%c3_95, %c0_96] : memref<8x128xf32, #tpu.memory_space<vmem>>, vector<1x128xf32>
    tpu.vector_store %arg7[%c3_95, %c0_96], %69 {strides = array<i32>} : memref<8x128xf32, #tpu.memory_space<vmem>>, vector<1x128xf32>,
    %c0_97 = arith.constant 0 : index
    %c4_98 = arith.constant 4 : index
    %c0_99 = arith.constant 0 : index
    %c0_100 = arith.constant 0 : index
    %71 = vector.load %arg2[%c0_97, %c4_98, %c0_99, %c0_100] : memref<2x8x8x128xf32, #tpu.memory_space<vmem>>, vector<1x1x8x128xf32>
    %72 = vector.shape_cast %71 : vector<1x1x8x128xf32> to vector<8x128xf32>
    %73 = arith.mulf %72, %46 : vector<8x128xf32>
    %cst_101 = arith.constant dense<0.000000e+00> : vector<128xf32>
    %74 = vector.multi_reduction <add>, %73, %cst_101 [0] : vector<8x128xf32> to vector<128xf32>
    %75 = vector.shape_cast %74 : vector<128xf32> to vector<1x128xf32>
    %c4_102 = arith.constant 4 : index
    %c0_103 = arith.constant 0 : index
    %76 = vector.load %arg7[%c4_102, %c0_103] : memref<8x128xf32, #tpu.memory_space<vmem>>, vector<1x128xf32>
    tpu.vector_store %arg7[%c4_102, %c0_103], %75 {strides = array<i32>} : memref<8x128xf32, #tpu.memory_space<vmem>>, vector<1x128xf32>,
    %c0_104 = arith.constant 0 : index
    %c5_105 = arith.constant 5 : index
    %c0_106 = arith.constant 0 : index
    %c0_107 = arith.constant 0 : index
    %77 = vector.load %arg2[%c0_104, %c5_105, %c0_106, %c0_107] : memref<2x8x8x128xf32, #tpu.memory_space<vmem>>, vector<1x1x8x128xf32>
    %78 = vector.shape_cast %77 : vector<1x1x8x128xf32> to vector<8x128xf32>
    %79 = arith.mulf %78, %46 : vector<8x128xf32>
    %cst_108 = arith.constant dense<0.000000e+00> : vector<128xf32>
    %80 = vector.multi_reduction <add>, %79, %cst_108 [0] : vector<8x128xf32> to vector<128xf32>
    %81 = vector.shape_cast %80 : vector<128xf32> to vector<1x128xf32>
    %c5_109 = arith.constant 5 : index
    %c0_110 = arith.constant 0 : index
    %82 = vector.load %arg7[%c5_109, %c0_110] : memref<8x128xf32, #tpu.memory_space<vmem>>, vector<1x128xf32>
    tpu.vector_store %arg7[%c5_109, %c0_110], %81 {strides = array<i32>} : memref<8x128xf32, #tpu.memory_space<vmem>>, vector<1x128xf32>,
    %c0_111 = arith.constant 0 : index
    %c6 = arith.constant 6 : index
    %c0_112 = arith.constant 0 : index
    %c0_113 = arith.constant 0 : index
    %83 = vector.load %arg2[%c0_111, %c6, %c0_112, %c0_113] : memref<2x8x8x128xf32, #tpu.memory_space<vmem>>, vector<1x1x8x128xf32>
    %84 = vector.shape_cast %83 : vector<1x1x8x128xf32> to vector<8x128xf32>
    %85 = arith.mulf %84, %46 : vector<8x128xf32>
    %cst_114 = arith.constant dense<0.000000e+00> : vector<128xf32>
    %86 = vector.multi_reduction <add>, %85, %cst_114 [0] : vector<8x128xf32> to vector<128xf32>
    %87 = vector.shape_cast %86 : vector<128xf32> to vector<1x128xf32>
    %c6_115 = arith.constant 6 : index
    %c0_116 = arith.constant 0 : index
    %88 = vector.load %arg7[%c6_115, %c0_116] : memref<8x128xf32, #tpu.memory_space<vmem>>, vector<1x128xf32>
    tpu.vector_store %arg7[%c6_115, %c0_116], %87 {strides = array<i32>} : memref<8x128xf32, #tpu.memory_space<vmem>>, vector<1x128xf32>,
    %c0_117 = arith.constant 0 : index
    %c7 = arith.constant 7 : index
    %c0_118 = arith.constant 0 : index
    %c0_119 = arith.constant 0 : index
    %89 = vector.load %arg2[%c0_117, %c7, %c0_118, %c0_119] : memref<2x8x8x128xf32, #tpu.memory_space<vmem>>, vector<1x1x8x128xf32>
    %90 = vector.shape_cast %89 : vector<1x1x8x128xf32> to vector<8x128xf32>
    %91 = arith.mulf %90, %46 : vector<8x128xf32>
    %cst_120 = arith.constant dense<0.000000e+00> : vector<128xf32>
    %92 = vector.multi_reduction <add>, %91, %cst_120 [0] : vector<8x128xf32> to vector<128xf32>
    %93 = vector.shape_cast %92 : vector<128xf32> to vector<1x128xf32>
    %c7_121 = arith.constant 7 : index
    %c0_122 = arith.constant 0 : index
    %94 = vector.load %arg7[%c7_121, %c0_122] : memref<8x128xf32, #tpu.memory_space<vmem>>, vector<1x128xf32>
    tpu.vector_store %arg7[%c7_121, %c0_122], %93 {strides = array<i32>} : memref<8x128xf32, #tpu.memory_space<vmem>>, vector<1x128xf32>,
    %c0_123 = arith.constant 0 : index
    %c0_124 = arith.constant 0 : index
    %95 = vector.load %arg7[%c0_123, %c0_124] : memref<8x128xf32, #tpu.memory_space<vmem>>, vector<8x128xf32>
    %96 = arith.addf %95, %29 : vector<8x128xf32>
    %97 = tpu.reciprocal %96 {approx = true} : vector<8x128xf32> -> vector<8x128xf32>
    %98 = arith.mulf %96, %97 : vector<8x128xf32>
    %cst_125 = arith.constant 2.000000e+00 : f32
    %99 = vector.broadcast %cst_125 : f32 to vector<8x128xf32>
    %100 = arith.subf %99, %98 : vector<8x128xf32>
    %101 = arith.mulf %97, %100 : vector<8x128xf32>
    %102 = arith.mulf %40, %101 : vector<8x128xf32>
    %103 = arith.mulf %43, %101 : vector<8x128xf32>
    %c0_126 = arith.constant 0 : index
    %c0_127 = arith.constant 0 : index
    %c0_128 = arith.constant 0 : index
    %c0_129 = arith.constant 0 : index
    %104 = vector.load %arg6[%c0_126, %c0_127, %c0_128, %c0_129] : memref<2x4x8x128xf32, #tpu.memory_space<vmem>>, vector<1x1x8x128xf32>
    %105 = vector.shape_cast %104 : vector<1x1x8x128xf32> to vector<8x128xf32>
    %106 = vector.shape_cast %102 : vector<8x128xf32> to vector<1x1x8x128xf32>
    tpu.vector_store %arg6[%c0_126, %c0_127, %c0_128, %c0_129], %106 {strides = array<i32>} : memref<2x4x8x128xf32, #tpu.memory_space<vmem>>, vector<1x1x8x128xf32>,
    %c0_130 = arith.constant 0 : index
    %c1_131 = arith.constant 1 : index
    %c0_132 = arith.constant 0 : index
    %c0_133 = arith.constant 0 : index
    %107 = vector.load %arg6[%c0_130, %c1_131, %c0_132, %c0_133] : memref<2x4x8x128xf32, #tpu.memory_space<vmem>>, vector<1x1x8x128xf32>
    %108 = vector.shape_cast %107 : vector<1x1x8x128xf32> to vector<8x128xf32>
    %109 = vector.shape_cast %103 : vector<8x128xf32> to vector<1x1x8x128xf32>
    tpu.vector_store %arg6[%c0_130, %c1_131, %c0_132, %c0_133], %109 {strides = array<i32>} : memref<2x4x8x128xf32, #tpu.memory_space<vmem>>, vector<1x1x8x128xf32>,
    %110 = arith.mulf %102, %40 : vector<8x128xf32>
    %111 = arith.mulf %103, %43 : vector<8x128xf32>
    %112 = arith.addf %110, %111 : vector<8x128xf32>
    %cst_134 = arith.constant 1.000000e+00 : f32
    %113 = vector.broadcast %cst_134 : f32 to vector<8x128xf32>
    %114 = arith.subf %113, %112 : vector<8x128xf32>
    %115 = arith.mulf %102, %43 : vector<8x128xf32>
    %116 = arith.mulf %103, %40 : vector<8x128xf32>
    %117 = arith.subf %115, %116 : vector<8x128xf32>
    %118 = arith.mulf %114, %114 : vector<8x128xf32>
    %119 = arith.mulf %117, %117 : vector<8x128xf32>
    %120 = arith.addf %118, %119 : vector<8x128xf32>
    %121 = tpu.reciprocal %120 {approx = true} : vector<8x128xf32> -> vector<8x128xf32>
    %122 = arith.mulf %120, %121 : vector<8x128xf32>
    %cst_135 = arith.constant 2.000000e+00 : f32
    %123 = vector.broadcast %cst_135 : f32 to vector<8x128xf32>
    %124 = arith.subf %123, %122 : vector<8x128xf32>
    %125 = arith.mulf %121, %124 : vector<8x128xf32>
    %126 = arith.mulf %114, %125 : vector<8x128xf32>
    %127 = arith.mulf %117, %125 : vector<8x128xf32>
    %c0_136 = arith.constant 0 : index
    %c2_137 = arith.constant 2 : index
    %c0_138 = arith.constant 0 : index
    %c0_139 = arith.constant 0 : index
    %128 = vector.load %arg6[%c0_136, %c2_137, %c0_138, %c0_139] : memref<2x4x8x128xf32, #tpu.memory_space<vmem>>, vector<1x1x8x128xf32>
    %129 = vector.shape_cast %128 : vector<1x1x8x128xf32> to vector<8x128xf32>
    %130 = vector.shape_cast %126 : vector<8x128xf32> to vector<1x1x8x128xf32>
    tpu.vector_store %arg6[%c0_136, %c2_137, %c0_138, %c0_139], %130 {strides = array<i32>} : memref<2x4x8x128xf32, #tpu.memory_space<vmem>>, vector<1x1x8x128xf32>,
    %c0_140 = arith.constant 0 : index
    %c3_141 = arith.constant 3 : index
    %c0_142 = arith.constant 0 : index
    %c0_143 = arith.constant 0 : index
    %131 = vector.load %arg6[%c0_140, %c3_141, %c0_142, %c0_143] : memref<2x4x8x128xf32, #tpu.memory_space<vmem>>, vector<1x1x8x128xf32>
    %132 = vector.shape_cast %131 : vector<1x1x8x128xf32> to vector<8x128xf32>
    %133 = vector.shape_cast %127 : vector<8x128xf32> to vector<1x1x8x128xf32>
    tpu.vector_store %arg6[%c0_140, %c3_141, %c0_142, %c0_143], %133 {strides = array<i32>} : memref<2x4x8x128xf32, #tpu.memory_space<vmem>>, vector<1x1x8x128xf32>,
    %134 = arith.mulf %25, %102 : vector<8x128xf32>
    %135 = arith.mulf %27, %103 : vector<8x128xf32>
    %136 = arith.addf %134, %135 : vector<8x128xf32>
    %137 = arith.mulf %25, %103 : vector<8x128xf32>
    %138 = arith.mulf %27, %102 : vector<8x128xf32>
    %139 = arith.subf %137, %138 : vector<8x128xf32>
    %140 = arith.mulf %136, %126 : vector<8x128xf32>
    %141 = arith.mulf %139, %127 : vector<8x128xf32>
    %142 = arith.subf %140, %141 : vector<8x128xf32>
    %143 = arith.mulf %136, %127 : vector<8x128xf32>
    %144 = arith.mulf %139, %126 : vector<8x128xf32>
    %145 = arith.addf %143, %144 : vector<8x128xf32>
    %146 = math.rsqrt %120 : vector<8x128xf32>
    %147 = arith.mulf %102, %102 : vector<8x128xf32>
    %148 = arith.mulf %103, %103 : vector<8x128xf32>
    %149 = arith.addf %147, %148 : vector<8x128xf32>
    %150 = arith.mulf %149, %146 : vector<8x128xf32>
    %cst_144 = arith.constant 0.000000e+00 : f32
    %151 = vector.broadcast %cst_144 : f32 to vector<8x128xf32>
    %c0_145 = arith.constant 0 : index
    %c0_146 = arith.constant 0 : index
    %c0_147 = arith.constant 0 : index
    %c0_148 = arith.constant 0 : index
    %152 = vector.load %arg2[%c0_145, %c0_146, %c0_147, %c0_148] : memref<2x8x8x128xf32, #tpu.memory_space<vmem>>, vector<1x1x8x128xf32>
    %153 = vector.shape_cast %152 : vector<1x1x8x128xf32> to vector<8x128xf32>
    %154 = vector.extract_strided_slice %150 {offsets = [0, 0], sizes = [1, 128], strides = [1, 1]} : vector<8x128xf32> to vector<1x128xf32>
    %155 = vector.broadcast %154 : vector<1x128xf32> to vector<8x128xf32>
    %156 = arith.mulf %153, %155 : vector<8x128xf32>
    %157 = arith.addf %151, %156 : vector<8x128xf32>
    %c0_149 = arith.constant 0 : index
    %c1_150 = arith.constant 1 : index
    %c0_151 = arith.constant 0 : index
    %c0_152 = arith.constant 0 : index
    %158 = vector.load %arg2[%c0_149, %c1_150, %c0_151, %c0_152] : memref<2x8x8x128xf32, #tpu.memory_space<vmem>>, vector<1x1x8x128xf32>
    %159 = vector.shape_cast %158 : vector<1x1x8x128xf32> to vector<8x128xf32>
    %160 = vector.extract_strided_slice %150 {offsets = [1, 0], sizes = [1, 128], strides = [1, 1]} : vector<8x128xf32> to vector<1x128xf32>
    %161 = vector.broadcast %160 : vector<1x128xf32> to vector<8x128xf32>
    %162 = arith.mulf %159, %161 : vector<8x128xf32>
    %163 = arith.addf %157, %162 : vector<8x128xf32>
    %c0_153 = arith.constant 0 : index
    %c2_154 = arith.constant 2 : index
    %c0_155 = arith.constant 0 : index
    %c0_156 = arith.constant 0 : index
    %164 = vector.load %arg2[%c0_153, %c2_154, %c0_155, %c0_156] : memref<2x8x8x128xf32, #tpu.memory_space<vmem>>, vector<1x1x8x128xf32>
    %165 = vector.shape_cast %164 : vector<1x1x8x128xf32> to vector<8x128xf32>
    %166 = vector.extract_strided_slice %150 {offsets = [2, 0], sizes = [1, 128], strides = [1, 1]} : vector<8x128xf32> to vector<1x128xf32>
    %167 = vector.broadcast %166 : vector<1x128xf32> to vector<8x128xf32>
    %168 = arith.mulf %165, %167 : vector<8x128xf32>
    %169 = arith.addf %163, %168 : vector<8x128xf32>
    %c0_157 = arith.constant 0 : index
    %c3_158 = arith.constant 3 : index
    %c0_159 = arith.constant 0 : index
    %c0_160 = arith.constant 0 : index
    %170 = vector.load %arg2[%c0_157, %c3_158, %c0_159, %c0_160] : memref<2x8x8x128xf32, #tpu.memory_space<vmem>>, vector<1x1x8x128xf32>
    %171 = vector.shape_cast %170 : vector<1x1x8x128xf32> to vector<8x128xf32>
    %172 = vector.extract_strided_slice %150 {offsets = [3, 0], sizes = [1, 128], strides = [1, 1]} : vector<8x128xf32> to vector<1x128xf32>
    %173 = vector.broadcast %172 : vector<1x128xf32> to vector<8x128xf32>
    %174 = arith.mulf %171, %173 : vector<8x128xf32>
    %175 = arith.addf %169, %174 : vector<8x128xf32>
    %c0_161 = arith.constant 0 : index
    %c4_162 = arith.constant 4 : index
    %c0_163 = arith.constant 0 : index
    %c0_164 = arith.constant 0 : index
    %176 = vector.load %arg2[%c0_161, %c4_162, %c0_163, %c0_164] : memref<2x8x8x128xf32, #tpu.memory_space<vmem>>, vector<1x1x8x128xf32>
    %177 = vector.shape_cast %176 : vector<1x1x8x128xf32> to vector<8x128xf32>
    %178 = vector.extract_strided_slice %150 {offsets = [4, 0], sizes = [1, 128], strides = [1, 1]} : vector<8x128xf32> to vector<1x128xf32>
    %179 = vector.broadcast %178 : vector<1x128xf32> to vector<8x128xf32>
    %180 = arith.mulf %177, %179 : vector<8x128xf32>
    %181 = arith.addf %175, %180 : vector<8x128xf32>
    %c0_165 = arith.constant 0 : index
    %c5_166 = arith.constant 5 : index
    %c0_167 = arith.constant 0 : index
    %c0_168 = arith.constant 0 : index
    %182 = vector.load %arg2[%c0_165, %c5_166, %c0_167, %c0_168] : memref<2x8x8x128xf32, #tpu.memory_space<vmem>>, vector<1x1x8x128xf32>
    %183 = vector.shape_cast %182 : vector<1x1x8x128xf32> to vector<8x128xf32>
    %184 = vector.extract_strided_slice %150 {offsets = [5, 0], sizes = [1, 128], strides = [1, 1]} : vector<8x128xf32> to vector<1x128xf32>
    %185 = vector.broadcast %184 : vector<1x128xf32> to vector<8x128xf32>
    %186 = arith.mulf %183, %185 : vector<8x128xf32>
    %187 = arith.addf %181, %186 : vector<8x128xf32>
    %c0_169 = arith.constant 0 : index
    %c6_170 = arith.constant 6 : index
    %c0_171 = arith.constant 0 : index
    %c0_172 = arith.constant 0 : index
    %188 = vector.load %arg2[%c0_169, %c6_170, %c0_171, %c0_172] : memref<2x8x8x128xf32, #tpu.memory_space<vmem>>, vector<1x1x8x128xf32>
    %189 = vector.shape_cast %188 : vector<1x1x8x128xf32> to vector<8x128xf32>
    %190 = vector.extract_strided_slice %150 {offsets = [6, 0], sizes = [1, 128], strides = [1, 1]} : vector<8x128xf32> to vector<1x128xf32>
    %191 = vector.broadcast %190 : vector<1x128xf32> to vector<8x128xf32>
    %192 = arith.mulf %189, %191 : vector<8x128xf32>
    %193 = arith.addf %187, %192 : vector<8x128xf32>
    %c0_173 = arith.constant 0 : index
    %c7_174 = arith.constant 7 : index
    %c0_175 = arith.constant 0 : index
    %c0_176 = arith.constant 0 : index
    %194 = vector.load %arg2[%c0_173, %c7_174, %c0_175, %c0_176] : memref<2x8x8x128xf32, #tpu.memory_space<vmem>>, vector<1x1x8x128xf32>
    %195 = vector.shape_cast %194 : vector<1x1x8x128xf32> to vector<8x128xf32>
    %196 = vector.extract_strided_slice %150 {offsets = [7, 0], sizes = [1, 128], strides = [1, 1]} : vector<8x128xf32> to vector<1x128xf32>
    %197 = vector.broadcast %196 : vector<1x128xf32> to vector<8x128xf32>
    %198 = arith.mulf %195, %197 : vector<8x128xf32>
    %199 = arith.addf %193, %198 : vector<8x128xf32>
    %200 = arith.mulf %142, %142 : vector<8x128xf32>
    %201 = arith.mulf %145, %145 : vector<8x128xf32>
    %202 = arith.addf %200, %201 : vector<8x128xf32>
    %203 = math.sqrt %202 : vector<8x128xf32>
    %204 = arith.mulf %203, %33 : vector<8x128xf32>
    %205 = arith.subf %204, %199 : vector<8x128xf32>
    %cst_177 = arith.constant 0.000000e+00 : f32
    %206 = vector.broadcast %cst_177 : f32 to vector<8x128xf32>
    %207 = arith.maximumf %205, %206 : vector<8x128xf32>
    %208 = arith.addf %199, %207 : vector<8x128xf32>
    %209 = tpu.reciprocal %208 {approx = true} : vector<8x128xf32> -> vector<8x128xf32>
    %210 = arith.mulf %208, %209 : vector<8x128xf32>
    %cst_178 = arith.constant 2.000000e+00 : f32
    %211 = vector.broadcast %cst_178 : f32 to vector<8x128xf32>
    %212 = arith.subf %211, %210 : vector<8x128xf32>
    %213 = arith.mulf %209, %212 : vector<8x128xf32>
    %cst_179 = arith.constant 0.000000e+00 : f32
    %214 = vector.broadcast %cst_179 : f32 to vector<8x128xf32>
    %cst_180 = arith.constant 0.000000e+00 : f32
    %215 = vector.broadcast %cst_180 : f32 to vector<8x128xf32>
    %216 = vector.broadcast %0 : f32 to vector<8x128xf32>
    %217 = arith.mulf %216, %213 : vector<8x128xf32>
    %218 = vector.broadcast %2 : f32 to vector<8x128xf32>
    %219 = arith.addf %217, %218 : vector<8x128xf32>
    %220 = vector.broadcast %1 : f32 to vector<8x128xf32>
    %221 = arith.mulf %220, %213 : vector<8x128xf32>
    %222 = vector.broadcast %3 : f32 to vector<8x128xf32>
    %223 = arith.addf %221, %222 : vector<8x128xf32>
    %224 = arith.mulf %142, %219 : vector<8x128xf32>
    %225 = arith.mulf %145, %223 : vector<8x128xf32>
    %226 = arith.subf %224, %225 : vector<8x128xf32>
    %cst_181 = arith.constant 0.000000e+00 : f32
    %227 = vector.broadcast %cst_181 : f32 to vector<8x128xf32>
    %228 = arith.maximumf %226, %227 : vector<8x128xf32>
    %229 = arith.mulf %142, %223 : vector<8x128xf32>
    %230 = arith.mulf %145, %219 : vector<8x128xf32>
    %231 = arith.addf %229, %230 : vector<8x128xf32>
    %cst_182 = arith.constant 0.000000e+00 : f32
    %232 = vector.broadcast %cst_182 : f32 to vector<8x128xf32>
    %233 = arith.maximumf %231, %232 : vector<8x128xf32>
    %234 = vector.broadcast %4 : f32 to vector<8x128xf32>
    %235 = arith.mulf %228, %234 : vector<8x128xf32>
    %236 = vector.broadcast %5 : f32 to vector<8x128xf32>
    %237 = arith.mulf %233, %236 : vector<8x128xf32>
    %238 = arith.subf %235, %237 : vector<8x128xf32>
    %239 = arith.addf %214, %238 : vector<8x128xf32>
    %240 = vector.broadcast %5 : f32 to vector<8x128xf32>
    %241 = arith.mulf %228, %240 : vector<8x128xf32>
    %242 = vector.broadcast %4 : f32 to vector<8x128xf32>
    %243 = arith.mulf %233, %242 : vector<8x128xf32>
    %244 = arith.addf %241, %243 : vector<8x128xf32>
    %245 = arith.addf %215, %244 : vector<8x128xf32>
    %246 = vector.broadcast %6 : f32 to vector<8x128xf32>
    %247 = arith.mulf %246, %213 : vector<8x128xf32>
    %248 = vector.broadcast %8 : f32 to vector<8x128xf32>
    %249 = arith.addf %247, %248 : vector<8x128xf32>
    %250 = vector.broadcast %7 : f32 to vector<8x128xf32>
    %251 = arith.mulf %250, %213 : vector<8x128xf32>
    %252 = vector.broadcast %9 : f32 to vector<8x128xf32>
    %253 = arith.addf %251, %252 : vector<8x128xf32>
    %254 = arith.mulf %142, %249 : vector<8x128xf32>
    %255 = arith.mulf %145, %253 : vector<8x128xf32>
    %256 = arith.subf %254, %255 : vector<8x128xf32>
    %cst_183 = arith.constant 0.000000e+00 : f32
    %257 = vector.broadcast %cst_183 : f32 to vector<8x128xf32>
    %258 = arith.maximumf %256, %257 : vector<8x128xf32>
    %259 = arith.mulf %142, %253 : vector<8x128xf32>
    %260 = arith.mulf %145, %249 : vector<8x128xf32>
    %261 = arith.addf %259, %260 : vector<8x128xf32>
    %cst_184 = arith.constant 0.000000e+00 : f32
    %262 = vector.broadcast %cst_184 : f32 to vector<8x128xf32>
    %263 = arith.maximumf %261, %262 : vector<8x128xf32>
    %264 = vector.broadcast %10 : f32 to vector<8x128xf32>
    %265 = arith.mulf %258, %264 : vector<8x128xf32>
    %266 = vector.broadcast %11 : f32 to vector<8x128xf32>
    %267 = arith.mulf %263, %266 : vector<8x128xf32>
    %268 = arith.subf %265, %267 : vector<8x128xf32>
    %269 = arith.addf %239, %268 : vector<8x128xf32>
    %270 = vector.broadcast %11 : f32 to vector<8x128xf32>
    %271 = arith.mulf %258, %270 : vector<8x128xf32>
    %272 = vector.broadcast %10 : f32 to vector<8x128xf32>
    %273 = arith.mulf %263, %272 : vector<8x128xf32>
    %274 = arith.addf %271, %273 : vector<8x128xf32>
    %275 = arith.addf %245, %274 : vector<8x128xf32>
    %276 = vector.broadcast %12 : f32 to vector<8x128xf32>
    %277 = arith.mulf %276, %213 : vector<8x128xf32>
    %278 = vector.broadcast %14 : f32 to vector<8x128xf32>
    %279 = arith.addf %277, %278 : vector<8x128xf32>
    %280 = vector.broadcast %13 : f32 to vector<8x128xf32>
    %281 = arith.mulf %280, %213 : vector<8x128xf32>
    %282 = vector.broadcast %15 : f32 to vector<8x128xf32>
    %283 = arith.addf %281, %282 : vector<8x128xf32>
    %284 = arith.mulf %142, %279 : vector<8x128xf32>
    %285 = arith.mulf %145, %283 : vector<8x128xf32>
    %286 = arith.subf %284, %285 : vector<8x128xf32>
    %cst_185 = arith.constant 0.000000e+00 : f32
    %287 = vector.broadcast %cst_185 : f32 to vector<8x128xf32>
    %288 = arith.maximumf %286, %287 : vector<8x128xf32>
    %289 = arith.mulf %142, %283 : vector<8x128xf32>
    %290 = arith.mulf %145, %279 : vector<8x128xf32>
    %291 = arith.addf %289, %290 : vector<8x128xf32>
    %cst_186 = arith.constant 0.000000e+00 : f32
    %292 = vector.broadcast %cst_186 : f32 to vector<8x128xf32>
    %293 = arith.maximumf %291, %292 : vector<8x128xf32>
    %294 = vector.broadcast %16 : f32 to vector<8x128xf32>
    %295 = arith.mulf %288, %294 : vector<8x128xf32>
    %296 = vector.broadcast %17 : f32 to vector<8x128xf32>
    %297 = arith.mulf %293, %296 : vector<8x128xf32>
    %298 = arith.subf %295, %297 : vector<8x128xf32>
    %299 = arith.addf %269, %298 : vector<8x128xf32>
    %300 = vector.broadcast %17 : f32 to vector<8x128xf32>
    %301 = arith.mulf %288, %300 : vector<8x128xf32>
    %302 = vector.broadcast %16 : f32 to vector<8x128xf32>
    %303 = arith.mulf %293, %302 : vector<8x128xf32>
    %304 = arith.addf %301, %303 : vector<8x128xf32>
    %305 = arith.addf %275, %304 : vector<8x128xf32>
    %306 = vector.broadcast %18 : f32 to vector<8x128xf32>
    %307 = arith.mulf %306, %213 : vector<8x128xf32>
    %308 = vector.broadcast %20 : f32 to vector<8x128xf32>
    %309 = arith.addf %307, %308 : vector<8x128xf32>
    %310 = vector.broadcast %19 : f32 to vector<8x128xf32>
    %311 = arith.mulf %310, %213 : vector<8x128xf32>
    %312 = vector.broadcast %21 : f32 to vector<8x128xf32>
    %313 = arith.addf %311, %312 : vector<8x128xf32>
    %314 = arith.mulf %142, %309 : vector<8x128xf32>
    %315 = arith.mulf %145, %313 : vector<8x128xf32>
    %316 = arith.subf %314, %315 : vector<8x128xf32>
    %cst_187 = arith.constant 0.000000e+00 : f32
    %317 = vector.broadcast %cst_187 : f32 to vector<8x128xf32>
    %318 = arith.maximumf %316, %317 : vector<8x128xf32>
    %319 = arith.mulf %142, %313 : vector<8x128xf32>
    %320 = arith.mulf %145, %309 : vector<8x128xf32>
    %321 = arith.addf %319, %320 : vector<8x128xf32>
    %cst_188 = arith.constant 0.000000e+00 : f32
    %322 = vector.broadcast %cst_188 : f32 to vector<8x128xf32>
    %323 = arith.maximumf %321, %322 : vector<8x128xf32>
    %324 = vector.broadcast %22 : f32 to vector<8x128xf32>
    %325 = arith.mulf %318, %324 : vector<8x128xf32>
    %326 = vector.broadcast %23 : f32 to vector<8x128xf32>
    %327 = arith.mulf %323, %326 : vector<8x128xf32>
    %328 = arith.subf %325, %327 : vector<8x128xf32>
    %329 = arith.addf %299, %328 : vector<8x128xf32>
    %330 = vector.broadcast %23 : f32 to vector<8x128xf32>
    %331 = arith.mulf %318, %330 : vector<8x128xf32>
    %332 = vector.broadcast %22 : f32 to vector<8x128xf32>
    %333 = arith.mulf %323, %332 : vector<8x128xf32>
    %334 = arith.addf %331, %333 : vector<8x128xf32>
    %335 = arith.addf %305, %334 : vector<8x128xf32>
    %336 = arith.mulf %329, %329 : vector<8x128xf32>
    %337 = arith.mulf %335, %335 : vector<8x128xf32>
    %338 = arith.addf %336, %337 : vector<8x128xf32>
    %339 = math.rsqrt %338 : vector<8x128xf32>
    %340 = arith.mulf %31, %339 : vector<8x128xf32>
    %cst_189 = arith.constant 1.000000e+00 : f32
    %341 = vector.broadcast %cst_189 : f32 to vector<8x128xf32>
    %342 = arith.minimumf %340, %341 : vector<8x128xf32>
    %343 = arith.mulf %329, %342 : vector<8x128xf32>
    %c0_190 = arith.constant 0 : index
    %c0_191 = arith.constant 0 : index
    %c0_192 = arith.constant 0 : index
    %c0_193 = arith.constant 0 : index
    %344 = vector.load %arg5[%c0_190, %c0_191, %c0_192, %c0_193] : memref<2x2x8x128xf32, #tpu.memory_space<vmem>>, vector<1x1x8x128xf32>
    %345 = vector.shape_cast %344 : vector<1x1x8x128xf32> to vector<8x128xf32>
    %346 = vector.shape_cast %343 : vector<8x128xf32> to vector<1x1x8x128xf32>
    tpu.vector_store %arg5[%c0_190, %c0_191, %c0_192, %c0_193], %346 {strides = array<i32>} : memref<2x2x8x128xf32, #tpu.memory_space<vmem>>, vector<1x1x8x128xf32>,
    %347 = arith.mulf %335, %342 : vector<8x128xf32>
    %c0_194 = arith.constant 0 : index
    %c1_195 = arith.constant 1 : index
    %c0_196 = arith.constant 0 : index
    %c0_197 = arith.constant 0 : index
    %348 = vector.load %arg5[%c0_194, %c1_195, %c0_196, %c0_197] : memref<2x2x8x128xf32, #tpu.memory_space<vmem>>, vector<1x1x8x128xf32>
    %349 = vector.shape_cast %348 : vector<1x1x8x128xf32> to vector<8x128xf32>
    %350 = vector.shape_cast %347 : vector<8x128xf32> to vector<1x1x8x128xf32>
    tpu.vector_store %arg5[%c0_194, %c1_195, %c0_196, %c0_197], %350 {strides = array<i32>} : memref<2x2x8x128xf32, #tpu.memory_space<vmem>>, vector<1x1x8x128xf32>,
    %c1_198 = arith.constant 1 : index
    %c0_199 = arith.constant 0 : index
    %c0_200 = arith.constant 0 : index
    %c0_201 = arith.constant 0 : index
    %351 = vector.load %arg3[%c1_198, %c0_199, %c0_200, %c0_201] : memref<2x5x8x128xf32, #tpu.memory_space<vmem>>, vector<1x1x8x128xf32>
    %352 = vector.shape_cast %351 : vector<1x1x8x128xf32> to vector<8x128xf32>
    %c1_202 = arith.constant 1 : index
    %c1_203 = arith.constant 1 : index
    %c0_204 = arith.constant 0 : index
    %c0_205 = arith.constant 0 : index
    %353 = vector.load %arg3[%c1_202, %c1_203, %c0_204, %c0_205] : memref<2x5x8x128xf32, #tpu.memory_space<vmem>>, vector<1x1x8x128xf32>
    %354 = vector.shape_cast %353 : vector<1x1x8x128xf32> to vector<8x128xf32>
    %c1_206 = arith.constant 1 : index
    %c2_207 = arith.constant 2 : index
    %c0_208 = arith.constant 0 : index
    %c0_209 = arith.constant 0 : index
    %355 = vector.load %arg3[%c1_206, %c2_207, %c0_208, %c0_209] : memref<2x5x8x128xf32, #tpu.memory_space<vmem>>, vector<1x1x8x128xf32>
    %356 = vector.shape_cast %355 : vector<1x1x8x128xf32> to vector<8x128xf32>
    %c1_210 = arith.constant 1 : index
    %c3_211 = arith.constant 3 : index
    %c0_212 = arith.constant 0 : index
    %c0_213 = arith.constant 0 : index
    %357 = vector.load %arg3[%c1_210, %c3_211, %c0_212, %c0_213] : memref<2x5x8x128xf32, #tpu.memory_space<vmem>>, vector<1x1x8x128xf32>
    %358 = vector.shape_cast %357 : vector<1x1x8x128xf32> to vector<8x128xf32>
    %c1_214 = arith.constant 1 : index
    %c4_215 = arith.constant 4 : index
    %c0_216 = arith.constant 0 : index
    %c0_217 = arith.constant 0 : index
    %359 = vector.load %arg3[%c1_214, %c4_215, %c0_216, %c0_217] : memref<2x5x8x128xf32, #tpu.memory_space<vmem>>, vector<1x1x8x128xf32>
    %360 = vector.shape_cast %359 : vector<1x1x8x128xf32> to vector<8x128xf32>
    %c1_218 = arith.constant 1 : index
    %c0_219 = arith.constant 0 : index
    %c0_220 = arith.constant 0 : index
    %c0_221 = arith.constant 0 : index
    %361 = vector.load %arg4[%c1_218, %c0_219, %c0_220, %c0_221] : memref<2x2x8x128xf32, #tpu.memory_space<vmem>>, vector<1x1x8x128xf32>
    %362 = vector.shape_cast %361 : vector<1x1x8x128xf32> to vector<8x128xf32>
    %c1_222 = arith.constant 1 : index
    %c1_223 = arith.constant 1 : index
    %c0_224 = arith.constant 0 : index
    %c0_225 = arith.constant 0 : index
    %363 = vector.load %arg4[%c1_222, %c1_223, %c0_224, %c0_225] : memref<2x2x8x128xf32, #tpu.memory_space<vmem>>, vector<1x1x8x128xf32>
    %364 = vector.shape_cast %363 : vector<1x1x8x128xf32> to vector<8x128xf32>
    %365 = arith.mulf %352, %362 : vector<8x128xf32>
    %366 = arith.mulf %354, %364 : vector<8x128xf32>
    %367 = arith.subf %365, %366 : vector<8x128xf32>
    %368 = arith.mulf %352, %364 : vector<8x128xf32>
    %369 = arith.mulf %354, %362 : vector<8x128xf32>
    %370 = arith.addf %368, %369 : vector<8x128xf32>
    %371 = arith.mulf %362, %362 : vector<8x128xf32>
    %372 = arith.mulf %364, %364 : vector<8x128xf32>
    %373 = arith.addf %371, %372 : vector<8x128xf32>
    %c1_226 = arith.constant 1 : index
    %c0_227 = arith.constant 0 : index
    %c0_228 = arith.constant 0 : index
    %c0_229 = arith.constant 0 : index
    %374 = vector.load %arg2[%c1_226, %c0_227, %c0_228, %c0_229] : memref<2x8x8x128xf32, #tpu.memory_space<vmem>>, vector<1x1x8x128xf32>
    %375 = vector.shape_cast %374 : vector<1x1x8x128xf32> to vector<8x128xf32>
    %376 = arith.mulf %375, %373 : vector<8x128xf32>
    %cst_230 = arith.constant dense<0.000000e+00> : vector<128xf32>
    %377 = vector.multi_reduction <add>, %376, %cst_230 [0] : vector<8x128xf32> to vector<128xf32>
    %378 = vector.shape_cast %377 : vector<128xf32> to vector<1x128xf32>
    %c0_231 = arith.constant 0 : index
    %c0_232 = arith.constant 0 : index
    %379 = vector.load %arg7[%c0_231, %c0_232] : memref<8x128xf32, #tpu.memory_space<vmem>>, vector<1x128xf32>
    tpu.vector_store %arg7[%c0_231, %c0_232], %378 {strides = array<i32>} : memref<8x128xf32, #tpu.memory_space<vmem>>, vector<1x128xf32>,
    %c1_233 = arith.constant 1 : index
    %c1_234 = arith.constant 1 : index
    %c0_235 = arith.constant 0 : index
    %c0_236 = arith.constant 0 : index
    %380 = vector.load %arg2[%c1_233, %c1_234, %c0_235, %c0_236] : memref<2x8x8x128xf32, #tpu.memory_space<vmem>>, vector<1x1x8x128xf32>
    %381 = vector.shape_cast %380 : vector<1x1x8x128xf32> to vector<8x128xf32>
    %382 = arith.mulf %381, %373 : vector<8x128xf32>
    %cst_237 = arith.constant dense<0.000000e+00> : vector<128xf32>
    %383 = vector.multi_reduction <add>, %382, %cst_237 [0] : vector<8x128xf32> to vector<128xf32>
    %384 = vector.shape_cast %383 : vector<128xf32> to vector<1x128xf32>
    %c1_238 = arith.constant 1 : index
    %c0_239 = arith.constant 0 : index
    %385 = vector.load %arg7[%c1_238, %c0_239] : memref<8x128xf32, #tpu.memory_space<vmem>>, vector<1x128xf32>
    tpu.vector_store %arg7[%c1_238, %c0_239], %384 {strides = array<i32>} : memref<8x128xf32, #tpu.memory_space<vmem>>, vector<1x128xf32>,
    %c1_240 = arith.constant 1 : index
    %c2_241 = arith.constant 2 : index
    %c0_242 = arith.constant 0 : index
    %c0_243 = arith.constant 0 : index
    %386 = vector.load %arg2[%c1_240, %c2_241, %c0_242, %c0_243] : memref<2x8x8x128xf32, #tpu.memory_space<vmem>>, vector<1x1x8x128xf32>
    %387 = vector.shape_cast %386 : vector<1x1x8x128xf32> to vector<8x128xf32>
    %388 = arith.mulf %387, %373 : vector<8x128xf32>
    %cst_244 = arith.constant dense<0.000000e+00> : vector<128xf32>
    %389 = vector.multi_reduction <add>, %388, %cst_244 [0] : vector<8x128xf32> to vector<128xf32>
    %390 = vector.shape_cast %389 : vector<128xf32> to vector<1x128xf32>
    %c2_245 = arith.constant 2 : index
    %c0_246 = arith.constant 0 : index
    %391 = vector.load %arg7[%c2_245, %c0_246] : memref<8x128xf32, #tpu.memory_space<vmem>>, vector<1x128xf32>
    tpu.vector_store %arg7[%c2_245, %c0_246], %390 {strides = array<i32>} : memref<8x128xf32, #tpu.memory_space<vmem>>, vector<1x128xf32>,
    %c1_247 = arith.constant 1 : index
    %c3_248 = arith.constant 3 : index
    %c0_249 = arith.constant 0 : index
    %c0_250 = arith.constant 0 : index
    %392 = vector.load %arg2[%c1_247, %c3_248, %c0_249, %c0_250] : memref<2x8x8x128xf32, #tpu.memory_space<vmem>>, vector<1x1x8x128xf32>
    %393 = vector.shape_cast %392 : vector<1x1x8x128xf32> to vector<8x128xf32>
    %394 = arith.mulf %393, %373 : vector<8x128xf32>
    %cst_251 = arith.constant dense<0.000000e+00> : vector<128xf32>
    %395 = vector.multi_reduction <add>, %394, %cst_251 [0] : vector<8x128xf32> to vector<128xf32>
    %396 = vector.shape_cast %395 : vector<128xf32> to vector<1x128xf32>
    %c3_252 = arith.constant 3 : index
    %c0_253 = arith.constant 0 : index
    %397 = vector.load %arg7[%c3_252, %c0_253] : memref<8x128xf32, #tpu.memory_space<vmem>>, vector<1x128xf32>
    tpu.vector_store %arg7[%c3_252, %c0_253], %396 {strides = array<i32>} : memref<8x128xf32, #tpu.memory_space<vmem>>, vector<1x128xf32>,
    %c1_254 = arith.constant 1 : index
    %c4_255 = arith.constant 4 : index
    %c0_256 = arith.constant 0 : index
    %c0_257 = arith.constant 0 : index
    %398 = vector.load %arg2[%c1_254, %c4_255, %c0_256, %c0_257] : memref<2x8x8x128xf32, #tpu.memory_space<vmem>>, vector<1x1x8x128xf32>
    %399 = vector.shape_cast %398 : vector<1x1x8x128xf32> to vector<8x128xf32>
    %400 = arith.mulf %399, %373 : vector<8x128xf32>
    %cst_258 = arith.constant dense<0.000000e+00> : vector<128xf32>
    %401 = vector.multi_reduction <add>, %400, %cst_258 [0] : vector<8x128xf32> to vector<128xf32>
    %402 = vector.shape_cast %401 : vector<128xf32> to vector<1x128xf32>
    %c4_259 = arith.constant 4 : index
    %c0_260 = arith.constant 0 : index
    %403 = vector.load %arg7[%c4_259, %c0_260] : memref<8x128xf32, #tpu.memory_space<vmem>>, vector<1x128xf32>
    tpu.vector_store %arg7[%c4_259, %c0_260], %402 {strides = array<i32>} : memref<8x128xf32, #tpu.memory_space<vmem>>, vector<1x128xf32>,
    %c1_261 = arith.constant 1 : index
    %c5_262 = arith.constant 5 : index
    %c0_263 = arith.constant 0 : index
    %c0_264 = arith.constant 0 : index
    %404 = vector.load %arg2[%c1_261, %c5_262, %c0_263, %c0_264] : memref<2x8x8x128xf32, #tpu.memory_space<vmem>>, vector<1x1x8x128xf32>
    %405 = vector.shape_cast %404 : vector<1x1x8x128xf32> to vector<8x128xf32>
    %406 = arith.mulf %405, %373 : vector<8x128xf32>
    %cst_265 = arith.constant dense<0.000000e+00> : vector<128xf32>
    %407 = vector.multi_reduction <add>, %406, %cst_265 [0] : vector<8x128xf32> to vector<128xf32>
    %408 = vector.shape_cast %407 : vector<128xf32> to vector<1x128xf32>
    %c5_266 = arith.constant 5 : index
    %c0_267 = arith.constant 0 : index
    %409 = vector.load %arg7[%c5_266, %c0_267] : memref<8x128xf32, #tpu.memory_space<vmem>>, vector<1x128xf32>
    tpu.vector_store %arg7[%c5_266, %c0_267], %408 {strides = array<i32>} : memref<8x128xf32, #tpu.memory_space<vmem>>, vector<1x128xf32>,
    %c1_268 = arith.constant 1 : index
    %c6_269 = arith.constant 6 : index
    %c0_270 = arith.constant 0 : index
    %c0_271 = arith.constant 0 : index
    %410 = vector.load %arg2[%c1_268, %c6_269, %c0_270, %c0_271] : memref<2x8x8x128xf32, #tpu.memory_space<vmem>>, vector<1x1x8x128xf32>
    %411 = vector.shape_cast %410 : vector<1x1x8x128xf32> to vector<8x128xf32>
    %412 = arith.mulf %411, %373 : vector<8x128xf32>
    %cst_272 = arith.constant dense<0.000000e+00> : vector<128xf32>
    %413 = vector.multi_reduction <add>, %412, %cst_272 [0] : vector<8x128xf32> to vector<128xf32>
    %414 = vector.shape_cast %413 : vector<128xf32> to vector<1x128xf32>
    %c6_273 = arith.constant 6 : index
    %c0_274 = arith.constant 0 : index
    %415 = vector.load %arg7[%c6_273, %c0_274] : memref<8x128xf32, #tpu.memory_space<vmem>>, vector<1x128xf32>
    tpu.vector_store %arg7[%c6_273, %c0_274], %414 {strides = array<i32>} : memref<8x128xf32, #tpu.memory_space<vmem>>, vector<1x128xf32>,
    %c1_275 = arith.constant 1 : index
    %c7_276 = arith.constant 7 : index
    %c0_277 = arith.constant 0 : index
    %c0_278 = arith.constant 0 : index
    %416 = vector.load %arg2[%c1_275, %c7_276, %c0_277, %c0_278] : memref<2x8x8x128xf32, #tpu.memory_space<vmem>>, vector<1x1x8x128xf32>
    %417 = vector.shape_cast %416 : vector<1x1x8x128xf32> to vector<8x128xf32>
    %418 = arith.mulf %417, %373 : vector<8x128xf32>
    %cst_279 = arith.constant dense<0.000000e+00> : vector<128xf32>
    %419 = vector.multi_reduction <add>, %418, %cst_279 [0] : vector<8x128xf32> to vector<128xf32>
    %420 = vector.shape_cast %419 : vector<128xf32> to vector<1x128xf32>
    %c7_280 = arith.constant 7 : index
    %c0_281 = arith.constant 0 : index
    %421 = vector.load %arg7[%c7_280, %c0_281] : memref<8x128xf32, #tpu.memory_space<vmem>>, vector<1x128xf32>
    tpu.vector_store %arg7[%c7_280, %c0_281], %420 {strides = array<i32>} : memref<8x128xf32, #tpu.memory_space<vmem>>, vector<1x128xf32>,
    %c0_282 = arith.constant 0 : index
    %c0_283 = arith.constant 0 : index
    %422 = vector.load %arg7[%c0_282, %c0_283] : memref<8x128xf32, #tpu.memory_space<vmem>>, vector<8x128xf32>
    %423 = arith.addf %422, %356 : vector<8x128xf32>
    %424 = tpu.reciprocal %423 {approx = true} : vector<8x128xf32> -> vector<8x128xf32>
    %425 = arith.mulf %423, %424 : vector<8x128xf32>
    %cst_284 = arith.constant 2.000000e+00 : f32
    %426 = vector.broadcast %cst_284 : f32 to vector<8x128xf32>
    %427 = arith.subf %426, %425 : vector<8x128xf32>
    %428 = arith.mulf %424, %427 : vector<8x128xf32>
    %429 = arith.mulf %367, %428 : vector<8x128xf32>
    %430 = arith.mulf %370, %428 : vector<8x128xf32>
    %c1_285 = arith.constant 1 : index
    %c0_286 = arith.constant 0 : index
    %c0_287 = arith.constant 0 : index
    %c0_288 = arith.constant 0 : index
    %431 = vector.load %arg6[%c1_285, %c0_286, %c0_287, %c0_288] : memref<2x4x8x128xf32, #tpu.memory_space<vmem>>, vector<1x1x8x128xf32>
    %432 = vector.shape_cast %431 : vector<1x1x8x128xf32> to vector<8x128xf32>
    %433 = vector.shape_cast %429 : vector<8x128xf32> to vector<1x1x8x128xf32>
    tpu.vector_store %arg6[%c1_285, %c0_286, %c0_287, %c0_288], %433 {strides = array<i32>} : memref<2x4x8x128xf32, #tpu.memory_space<vmem>>, vector<1x1x8x128xf32>,
    %c1_289 = arith.constant 1 : index
    %c1_290 = arith.constant 1 : index
    %c0_291 = arith.constant 0 : index
    %c0_292 = arith.constant 0 : index
    %434 = vector.load %arg6[%c1_289, %c1_290, %c0_291, %c0_292] : memref<2x4x8x128xf32, #tpu.memory_space<vmem>>, vector<1x1x8x128xf32>
    %435 = vector.shape_cast %434 : vector<1x1x8x128xf32> to vector<8x128xf32>
    %436 = vector.shape_cast %430 : vector<8x128xf32> to vector<1x1x8x128xf32>
    tpu.vector_store %arg6[%c1_289, %c1_290, %c0_291, %c0_292], %436 {strides = array<i32>} : memref<2x4x8x128xf32, #tpu.memory_space<vmem>>, vector<1x1x8x128xf32>,
    %437 = arith.mulf %429, %367 : vector<8x128xf32>
    %438 = arith.mulf %430, %370 : vector<8x128xf32>
    %439 = arith.addf %437, %438 : vector<8x128xf32>
    %cst_293 = arith.constant 1.000000e+00 : f32
    %440 = vector.broadcast %cst_293 : f32 to vector<8x128xf32>
    %441 = arith.subf %440, %439 : vector<8x128xf32>
    %442 = arith.mulf %429, %370 : vector<8x128xf32>
    %443 = arith.mulf %430, %367 : vector<8x128xf32>
    %444 = arith.subf %442, %443 : vector<8x128xf32>
    %445 = arith.mulf %441, %441 : vector<8x128xf32>
    %446 = arith.mulf %444, %444 : vector<8x128xf32>
    %447 = arith.addf %445, %446 : vector<8x128xf32>
    %448 = tpu.reciprocal %447 {approx = true} : vector<8x128xf32> -> vector<8x128xf32>
    %449 = arith.mulf %447, %448 : vector<8x128xf32>
    %cst_294 = arith.constant 2.000000e+00 : f32
    %450 = vector.broadcast %cst_294 : f32 to vector<8x128xf32>
    %451 = arith.subf %450, %449 : vector<8x128xf32>
    %452 = arith.mulf %448, %451 : vector<8x128xf32>
    %453 = arith.mulf %441, %452 : vector<8x128xf32>
    %454 = arith.mulf %444, %452 : vector<8x128xf32>
    %c1_295 = arith.constant 1 : index
    %c2_296 = arith.constant 2 : index
    %c0_297 = arith.constant 0 : index
    %c0_298 = arith.constant 0 : index
    %455 = vector.load %arg6[%c1_295, %c2_296, %c0_297, %c0_298] : memref<2x4x8x128xf32, #tpu.memory_space<vmem>>, vector<1x1x8x128xf32>
    %456 = vector.shape_cast %455 : vector<1x1x8x128xf32> to vector<8x128xf32>
    %457 = vector.shape_cast %453 : vector<8x128xf32> to vector<1x1x8x128xf32>
    tpu.vector_store %arg6[%c1_295, %c2_296, %c0_297, %c0_298], %457 {strides = array<i32>} : memref<2x4x8x128xf32, #tpu.memory_space<vmem>>, vector<1x1x8x128xf32>,
    %c1_299 = arith.constant 1 : index
    %c3_300 = arith.constant 3 : index
    %c0_301 = arith.constant 0 : index
    %c0_302 = arith.constant 0 : index
    %458 = vector.load %arg6[%c1_299, %c3_300, %c0_301, %c0_302] : memref<2x4x8x128xf32, #tpu.memory_space<vmem>>, vector<1x1x8x128xf32>
    %459 = vector.shape_cast %458 : vector<1x1x8x128xf32> to vector<8x128xf32>
    %460 = vector.shape_cast %454 : vector<8x128xf32> to vector<1x1x8x128xf32>
    tpu.vector_store %arg6[%c1_299, %c3_300, %c0_301, %c0_302], %460 {strides = array<i32>} : memref<2x4x8x128xf32, #tpu.memory_space<vmem>>, vector<1x1x8x128xf32>,
    %461 = arith.mulf %352, %429 : vector<8x128xf32>
    %462 = arith.mulf %354, %430 : vector<8x128xf32>
    %463 = arith.addf %461, %462 : vector<8x128xf32>
    %464 = arith.mulf %352, %430 : vector<8x128xf32>
    %465 = arith.mulf %354, %429 : vector<8x128xf32>
    %466 = arith.subf %464, %465 : vector<8x128xf32>
    %467 = arith.mulf %463, %453 : vector<8x128xf32>
    %468 = arith.mulf %466, %454 : vector<8x128xf32>
    %469 = arith.subf %467, %468 : vector<8x128xf32>
    %470 = arith.mulf %463, %454 : vector<8x128xf32>
    %471 = arith.mulf %466, %453 : vector<8x128xf32>
    %472 = arith.addf %470, %471 : vector<8x128xf32>
    %473 = math.rsqrt %447 : vector<8x128xf32>
    %474 = arith.mulf %429, %429 : vector<8x128xf32>
    %475 = arith.mulf %430, %430 : vector<8x128xf32>
    %476 = arith.addf %474, %475 : vector<8x128xf32>
    %477 = arith.mulf %476, %473 : vector<8x128xf32>
    %cst_303 = arith.constant 0.000000e+00 : f32
    %478 = vector.broadcast %cst_303 : f32 to vector<8x128xf32>
    %c1_304 = arith.constant 1 : index
    %c0_305 = arith.constant 0 : index
    %c0_306 = arith.constant 0 : index
    %c0_307 = arith.constant 0 : index
    %479 = vector.load %arg2[%c1_304, %c0_305, %c0_306, %c0_307] : memref<2x8x8x128xf32, #tpu.memory_space<vmem>>, vector<1x1x8x128xf32>
    %480 = vector.shape_cast %479 : vector<1x1x8x128xf32> to vector<8x128xf32>
    %481 = vector.extract_strided_slice %477 {offsets = [0, 0], sizes = [1, 128], strides = [1, 1]} : vector<8x128xf32> to vector<1x128xf32>
    %482 = vector.broadcast %481 : vector<1x128xf32> to vector<8x128xf32>
    %483 = arith.mulf %480, %482 : vector<8x128xf32>
    %484 = arith.addf %478, %483 : vector<8x128xf32>
    %c1_308 = arith.constant 1 : index
    %c1_309 = arith.constant 1 : index
    %c0_310 = arith.constant 0 : index
    %c0_311 = arith.constant 0 : index
    %485 = vector.load %arg2[%c1_308, %c1_309, %c0_310, %c0_311] : memref<2x8x8x128xf32, #tpu.memory_space<vmem>>, vector<1x1x8x128xf32>
    %486 = vector.shape_cast %485 : vector<1x1x8x128xf32> to vector<8x128xf32>
    %487 = vector.extract_strided_slice %477 {offsets = [1, 0], sizes = [1, 128], strides = [1, 1]} : vector<8x128xf32> to vector<1x128xf32>
    %488 = vector.broadcast %487 : vector<1x128xf32> to vector<8x128xf32>
    %489 = arith.mulf %486, %488 : vector<8x128xf32>
    %490 = arith.addf %484, %489 : vector<8x128xf32>
    %c1_312 = arith.constant 1 : index
    %c2_313 = arith.constant 2 : index
    %c0_314 = arith.constant 0 : index
    %c0_315 = arith.constant 0 : index
    %491 = vector.load %arg2[%c1_312, %c2_313, %c0_314, %c0_315] : memref<2x8x8x128xf32, #tpu.memory_space<vmem>>, vector<1x1x8x128xf32>
    %492 = vector.shape_cast %491 : vector<1x1x8x128xf32> to vector<8x128xf32>
    %493 = vector.extract_strided_slice %477 {offsets = [2, 0], sizes = [1, 128], strides = [1, 1]} : vector<8x128xf32> to vector<1x128xf32>
    %494 = vector.broadcast %493 : vector<1x128xf32> to vector<8x128xf32>
    %495 = arith.mulf %492, %494 : vector<8x128xf32>
    %496 = arith.addf %490, %495 : vector<8x128xf32>
    %c1_316 = arith.constant 1 : index
    %c3_317 = arith.constant 3 : index
    %c0_318 = arith.constant 0 : index
    %c0_319 = arith.constant 0 : index
    %497 = vector.load %arg2[%c1_316, %c3_317, %c0_318, %c0_319] : memref<2x8x8x128xf32, #tpu.memory_space<vmem>>, vector<1x1x8x128xf32>
    %498 = vector.shape_cast %497 : vector<1x1x8x128xf32> to vector<8x128xf32>
    %499 = vector.extract_strided_slice %477 {offsets = [3, 0], sizes = [1, 128], strides = [1, 1]} : vector<8x128xf32> to vector<1x128xf32>
    %500 = vector.broadcast %499 : vector<1x128xf32> to vector<8x128xf32>
    %501 = arith.mulf %498, %500 : vector<8x128xf32>
    %502 = arith.addf %496, %501 : vector<8x128xf32>
    %c1_320 = arith.constant 1 : index
    %c4_321 = arith.constant 4 : index
    %c0_322 = arith.constant 0 : index
    %c0_323 = arith.constant 0 : index
    %503 = vector.load %arg2[%c1_320, %c4_321, %c0_322, %c0_323] : memref<2x8x8x128xf32, #tpu.memory_space<vmem>>, vector<1x1x8x128xf32>
    %504 = vector.shape_cast %503 : vector<1x1x8x128xf32> to vector<8x128xf32>
    %505 = vector.extract_strided_slice %477 {offsets = [4, 0], sizes = [1, 128], strides = [1, 1]} : vector<8x128xf32> to vector<1x128xf32>
    %506 = vector.broadcast %505 : vector<1x128xf32> to vector<8x128xf32>
    %507 = arith.mulf %504, %506 : vector<8x128xf32>
    %508 = arith.addf %502, %507 : vector<8x128xf32>
    %c1_324 = arith.constant 1 : index
    %c5_325 = arith.constant 5 : index
    %c0_326 = arith.constant 0 : index
    %c0_327 = arith.constant 0 : index
    %509 = vector.load %arg2[%c1_324, %c5_325, %c0_326, %c0_327] : memref<2x8x8x128xf32, #tpu.memory_space<vmem>>, vector<1x1x8x128xf32>
    %510 = vector.shape_cast %509 : vector<1x1x8x128xf32> to vector<8x128xf32>
    %511 = vector.extract_strided_slice %477 {offsets = [5, 0], sizes = [1, 128], strides = [1, 1]} : vector<8x128xf32> to vector<1x128xf32>
    %512 = vector.broadcast %511 : vector<1x128xf32> to vector<8x128xf32>
    %513 = arith.mulf %510, %512 : vector<8x128xf32>
    %514 = arith.addf %508, %513 : vector<8x128xf32>
    %c1_328 = arith.constant 1 : index
    %c6_329 = arith.constant 6 : index
    %c0_330 = arith.constant 0 : index
    %c0_331 = arith.constant 0 : index
    %515 = vector.load %arg2[%c1_328, %c6_329, %c0_330, %c0_331] : memref<2x8x8x128xf32, #tpu.memory_space<vmem>>, vector<1x1x8x128xf32>
    %516 = vector.shape_cast %515 : vector<1x1x8x128xf32> to vector<8x128xf32>
    %517 = vector.extract_strided_slice %477 {offsets = [6, 0], sizes = [1, 128], strides = [1, 1]} : vector<8x128xf32> to vector<1x128xf32>
    %518 = vector.broadcast %517 : vector<1x128xf32> to vector<8x128xf32>
    %519 = arith.mulf %516, %518 : vector<8x128xf32>
    %520 = arith.addf %514, %519 : vector<8x128xf32>
    %c1_332 = arith.constant 1 : index
    %c7_333 = arith.constant 7 : index
    %c0_334 = arith.constant 0 : index
    %c0_335 = arith.constant 0 : index
    %521 = vector.load %arg2[%c1_332, %c7_333, %c0_334, %c0_335] : memref<2x8x8x128xf32, #tpu.memory_space<vmem>>, vector<1x1x8x128xf32>
    %522 = vector.shape_cast %521 : vector<1x1x8x128xf32> to vector<8x128xf32>
    %523 = vector.extract_strided_slice %477 {offsets = [7, 0], sizes = [1, 128], strides = [1, 1]} : vector<8x128xf32> to vector<1x128xf32>
    %524 = vector.broadcast %523 : vector<1x128xf32> to vector<8x128xf32>
    %525 = arith.mulf %522, %524 : vector<8x128xf32>
    %526 = arith.addf %520, %525 : vector<8x128xf32>
    %527 = arith.mulf %469, %469 : vector<8x128xf32>
    %528 = arith.mulf %472, %472 : vector<8x128xf32>
    %529 = arith.addf %527, %528 : vector<8x128xf32>
    %530 = math.sqrt %529 : vector<8x128xf32>
    %531 = arith.mulf %530, %360 : vector<8x128xf32>
    %532 = arith.subf %531, %526 : vector<8x128xf32>
    %cst_336 = arith.constant 0.000000e+00 : f32
    %533 = vector.broadcast %cst_336 : f32 to vector<8x128xf32>
    %534 = arith.maximumf %532, %533 : vector<8x128xf32>
    %535 = arith.addf %526, %534 : vector<8x128xf32>
    %536 = tpu.reciprocal %535 {approx = true} : vector<8x128xf32> -> vector<8x128xf32>
    %537 = arith.mulf %535, %536 : vector<8x128xf32>
    %cst_337 = arith.constant 2.000000e+00 : f32
    %538 = vector.broadcast %cst_337 : f32 to vector<8x128xf32>
    %539 = arith.subf %538, %537 : vector<8x128xf32>
    %540 = arith.mulf %536, %539 : vector<8x128xf32>
    %cst_338 = arith.constant 0.000000e+00 : f32
    %541 = vector.broadcast %cst_338 : f32 to vector<8x128xf32>
    %cst_339 = arith.constant 0.000000e+00 : f32
    %542 = vector.broadcast %cst_339 : f32 to vector<8x128xf32>
    %543 = vector.broadcast %0 : f32 to vector<8x128xf32>
    %544 = arith.mulf %543, %540 : vector<8x128xf32>
    %545 = vector.broadcast %2 : f32 to vector<8x128xf32>
    %546 = arith.addf %544, %545 : vector<8x128xf32>
    %547 = vector.broadcast %1 : f32 to vector<8x128xf32>
    %548 = arith.mulf %547, %540 : vector<8x128xf32>
    %549 = vector.broadcast %3 : f32 to vector<8x128xf32>
    %550 = arith.addf %548, %549 : vector<8x128xf32>
    %551 = arith.mulf %469, %546 : vector<8x128xf32>
    %552 = arith.mulf %472, %550 : vector<8x128xf32>
    %553 = arith.subf %551, %552 : vector<8x128xf32>
    %cst_340 = arith.constant 0.000000e+00 : f32
    %554 = vector.broadcast %cst_340 : f32 to vector<8x128xf32>
    %555 = arith.maximumf %553, %554 : vector<8x128xf32>
    %556 = arith.mulf %469, %550 : vector<8x128xf32>
    %557 = arith.mulf %472, %546 : vector<8x128xf32>
    %558 = arith.addf %556, %557 : vector<8x128xf32>
    %cst_341 = arith.constant 0.000000e+00 : f32
    %559 = vector.broadcast %cst_341 : f32 to vector<8x128xf32>
    %560 = arith.maximumf %558, %559 : vector<8x128xf32>
    %561 = vector.broadcast %4 : f32 to vector<8x128xf32>
    %562 = arith.mulf %555, %561 : vector<8x128xf32>
    %563 = vector.broadcast %5 : f32 to vector<8x128xf32>
    %564 = arith.mulf %560, %563 : vector<8x128xf32>
    %565 = arith.subf %562, %564 : vector<8x128xf32>
    %566 = arith.addf %541, %565 : vector<8x128xf32>
    %567 = vector.broadcast %5 : f32 to vector<8x128xf32>
    %568 = arith.mulf %555, %567 : vector<8x128xf32>
    %569 = vector.broadcast %4 : f32 to vector<8x128xf32>
    %570 = arith.mulf %560, %569 : vector<8x128xf32>
    %571 = arith.addf %568, %570 : vector<8x128xf32>
    %572 = arith.addf %542, %571 : vector<8x128xf32>
    %573 = vector.broadcast %6 : f32 to vector<8x128xf32>
    %574 = arith.mulf %573, %540 : vector<8x128xf32>
    %575 = vector.broadcast %8 : f32 to vector<8x128xf32>
    %576 = arith.addf %574, %575 : vector<8x128xf32>
    %577 = vector.broadcast %7 : f32 to vector<8x128xf32>
    %578 = arith.mulf %577, %540 : vector<8x128xf32>
    %579 = vector.broadcast %9 : f32 to vector<8x128xf32>
    %580 = arith.addf %578, %579 : vector<8x128xf32>
    %581 = arith.mulf %469, %576 : vector<8x128xf32>
    %582 = arith.mulf %472, %580 : vector<8x128xf32>
    %583 = arith.subf %581, %582 : vector<8x128xf32>
    %cst_342 = arith.constant 0.000000e+00 : f32
    %584 = vector.broadcast %cst_342 : f32 to vector<8x128xf32>
    %585 = arith.maximumf %583, %584 : vector<8x128xf32>
    %586 = arith.mulf %469, %580 : vector<8x128xf32>
    %587 = arith.mulf %472, %576 : vector<8x128xf32>
    %588 = arith.addf %586, %587 : vector<8x128xf32>
    %cst_343 = arith.constant 0.000000e+00 : f32
    %589 = vector.broadcast %cst_343 : f32 to vector<8x128xf32>
    %590 = arith.maximumf %588, %589 : vector<8x128xf32>
    %591 = vector.broadcast %10 : f32 to vector<8x128xf32>
    %592 = arith.mulf %585, %591 : vector<8x128xf32>
    %593 = vector.broadcast %11 : f32 to vector<8x128xf32>
    %594 = arith.mulf %590, %593 : vector<8x128xf32>
    %595 = arith.subf %592, %594 : vector<8x128xf32>
    %596 = arith.addf %566, %595 : vector<8x128xf32>
    %597 = vector.broadcast %11 : f32 to vector<8x128xf32>
    %598 = arith.mulf %585, %597 : vector<8x128xf32>
    %599 = vector.broadcast %10 : f32 to vector<8x128xf32>
    %600 = arith.mulf %590, %599 : vector<8x128xf32>
    %601 = arith.addf %598, %600 : vector<8x128xf32>
    %602 = arith.addf %572, %601 : vector<8x128xf32>
    %603 = vector.broadcast %12 : f32 to vector<8x128xf32>
    %604 = arith.mulf %603, %540 : vector<8x128xf32>
    %605 = vector.broadcast %14 : f32 to vector<8x128xf32>
    %606 = arith.addf %604, %605 : vector<8x128xf32>
    %607 = vector.broadcast %13 : f32 to vector<8x128xf32>
    %608 = arith.mulf %607, %540 : vector<8x128xf32>
    %609 = vector.broadcast %15 : f32 to vector<8x128xf32>
    %610 = arith.addf %608, %609 : vector<8x128xf32>
    %611 = arith.mulf %469, %606 : vector<8x128xf32>
    %612 = arith.mulf %472, %610 : vector<8x128xf32>
    %613 = arith.subf %611, %612 : vector<8x128xf32>
    %cst_344 = arith.constant 0.000000e+00 : f32
    %614 = vector.broadcast %cst_344 : f32 to vector<8x128xf32>
    %615 = arith.maximumf %613, %614 : vector<8x128xf32>
    %616 = arith.mulf %469, %610 : vector<8x128xf32>
    %617 = arith.mulf %472, %606 : vector<8x128xf32>
    %618 = arith.addf %616, %617 : vector<8x128xf32>
    %cst_345 = arith.constant 0.000000e+00 : f32
    %619 = vector.broadcast %cst_345 : f32 to vector<8x128xf32>
    %620 = arith.maximumf %618, %619 : vector<8x128xf32>
    %621 = vector.broadcast %16 : f32 to vector<8x128xf32>
    %622 = arith.mulf %615, %621 : vector<8x128xf32>
    %623 = vector.broadcast %17 : f32 to vector<8x128xf32>
    %624 = arith.mulf %620, %623 : vector<8x128xf32>
    %625 = arith.subf %622, %624 : vector<8x128xf32>
    %626 = arith.addf %596, %625 : vector<8x128xf32>
    %627 = vector.broadcast %17 : f32 to vector<8x128xf32>
    %628 = arith.mulf %615, %627 : vector<8x128xf32>
    %629 = vector.broadcast %16 : f32 to vector<8x128xf32>
    %630 = arith.mulf %620, %629 : vector<8x128xf32>
    %631 = arith.addf %628, %630 : vector<8x128xf32>
    %632 = arith.addf %602, %631 : vector<8x128xf32>
    %633 = vector.broadcast %18 : f32 to vector<8x128xf32>
    %634 = arith.mulf %633, %540 : vector<8x128xf32>
    %635 = vector.broadcast %20 : f32 to vector<8x128xf32>
    %636 = arith.addf %634, %635 : vector<8x128xf32>
    %637 = vector.broadcast %19 : f32 to vector<8x128xf32>
    %638 = arith.mulf %637, %540 : vector<8x128xf32>
    %639 = vector.broadcast %21 : f32 to vector<8x128xf32>
    %640 = arith.addf %638, %639 : vector<8x128xf32>
    %641 = arith.mulf %469, %636 : vector<8x128xf32>
    %642 = arith.mulf %472, %640 : vector<8x128xf32>
    %643 = arith.subf %641, %642 : vector<8x128xf32>
    %cst_346 = arith.constant 0.000000e+00 : f32
    %644 = vector.broadcast %cst_346 : f32 to vector<8x128xf32>
    %645 = arith.maximumf %643, %644 : vector<8x128xf32>
    %646 = arith.mulf %469, %640 : vector<8x128xf32>
    %647 = arith.mulf %472, %636 : vector<8x128xf32>
    %648 = arith.addf %646, %647 : vector<8x128xf32>
    %cst_347 = arith.constant 0.000000e+00 : f32
    %649 = vector.broadcast %cst_347 : f32 to vector<8x128xf32>
    %650 = arith.maximumf %648, %649 : vector<8x128xf32>
    %651 = vector.broadcast %22 : f32 to vector<8x128xf32>
    %652 = arith.mulf %645, %651 : vector<8x128xf32>
    %653 = vector.broadcast %23 : f32 to vector<8x128xf32>
    %654 = arith.mulf %650, %653 : vector<8x128xf32>
    %655 = arith.subf %652, %654 : vector<8x128xf32>
    %656 = arith.addf %626, %655 : vector<8x128xf32>
    %657 = vector.broadcast %23 : f32 to vector<8x128xf32>
    %658 = arith.mulf %645, %657 : vector<8x128xf32>
    %659 = vector.broadcast %22 : f32 to vector<8x128xf32>
    %660 = arith.mulf %650, %659 : vector<8x128xf32>
    %661 = arith.addf %658, %660 : vector<8x128xf32>
    %662 = arith.addf %632, %661 : vector<8x128xf32>
    %663 = arith.mulf %656, %656 : vector<8x128xf32>
    %664 = arith.mulf %662, %662 : vector<8x128xf32>
    %665 = arith.addf %663, %664 : vector<8x128xf32>
    %666 = math.rsqrt %665 : vector<8x128xf32>
    %667 = arith.mulf %358, %666 : vector<8x128xf32>
    %cst_348 = arith.constant 1.000000e+00 : f32
    %668 = vector.broadcast %cst_348 : f32 to vector<8x128xf32>
    %669 = arith.minimumf %667, %668 : vector<8x128xf32>
    %670 = arith.mulf %656, %669 : vector<8x128xf32>
    %c1_349 = arith.constant 1 : index
    %c0_350 = arith.constant 0 : index
    %c0_351 = arith.constant 0 : index
    %c0_352 = arith.constant 0 : index
    %671 = vector.load %arg5[%c1_349, %c0_350, %c0_351, %c0_352] : memref<2x2x8x128xf32, #tpu.memory_space<vmem>>, vector<1x1x8x128xf32>
    %672 = vector.shape_cast %671 : vector<1x1x8x128xf32> to vector<8x128xf32>
    %673 = vector.shape_cast %670 : vector<8x128xf32> to vector<1x1x8x128xf32>
    tpu.vector_store %arg5[%c1_349, %c0_350, %c0_351, %c0_352], %673 {strides = array<i32>} : memref<2x2x8x128xf32, #tpu.memory_space<vmem>>, vector<1x1x8x128xf32>,
    %674 = arith.mulf %662, %669 : vector<8x128xf32>
    %c1_353 = arith.constant 1 : index
    %c1_354 = arith.constant 1 : index
    %c0_355 = arith.constant 0 : index
    %c0_356 = arith.constant 0 : index
    %675 = vector.load %arg5[%c1_353, %c1_354, %c0_355, %c0_356] : memref<2x2x8x128xf32, #tpu.memory_space<vmem>>, vector<1x1x8x128xf32>
    %676 = vector.shape_cast %675 : vector<1x1x8x128xf32> to vector<8x128xf32>
    %677 = vector.shape_cast %674 : vector<8x128xf32> to vector<1x1x8x128xf32>
    tpu.vector_store %arg5[%c1_353, %c1_354, %c0_355, %c0_356], %677 {strides = array<i32>} : memref<2x2x8x128xf32, #tpu.memory_space<vmem>>, vector<1x1x8x128xf32>,
    return
  }
  func.func @transform_0(%arg0: i32) -> (i32, i32) {
    %c0_i32 = arith.constant 0 : i32
    %c0_i32_0 = arith.constant 0 : i32
    %c0_i32_1 = arith.constant 0 : i32
    return %c0_i32, %c0_i32_0 : i32, i32
  }
  func.func @transform_1(%arg0: i32) -> (i32, i32, i32, i32) {
    %c0_i32 = arith.constant 0 : i32
    %c0_i32_0 = arith.constant 0 : i32
    %c0_i32_1 = arith.constant 0 : i32
    %c0_i32_2 = arith.constant 0 : i32
    return %arg0, %c0_i32, %c0_i32_0, %c0_i32_1 : i32, i32, i32, i32
  }
  func.func @transform_2(%arg0: i32) -> (i32, i32, i32, i32) {
    %c0_i32 = arith.constant 0 : i32
    %c0_i32_0 = arith.constant 0 : i32
    %c0_i32_1 = arith.constant 0 : i32
    %c0_i32_2 = arith.constant 0 : i32
    return %arg0, %c0_i32, %c0_i32_0, %c0_i32_1 : i32, i32, i32, i32
  }
  func.func @transform_3(%arg0: i32) -> (i32, i32, i32, i32) {
    %c0_i32 = arith.constant 0 : i32
    %c0_i32_0 = arith.constant 0 : i32
    %c0_i32_1 = arith.constant 0 : i32
    %c0_i32_2 = arith.constant 0 : i32
    return %arg0, %c0_i32, %c0_i32_0, %c0_i32_1 : i32, i32, i32, i32
  }
  func.func @transform_4(%arg0: i32) -> (i32, i32, i32, i32) {
    %c0_i32 = arith.constant 0 : i32
    %c0_i32_0 = arith.constant 0 : i32
    %c0_i32_1 = arith.constant 0 : i32
    %c0_i32_2 = arith.constant 0 : i32
    return %arg0, %c0_i32, %c0_i32_0, %c0_i32_1 : i32, i32, i32, i32
  }
  func.func @transform_5(%arg0: i32) -> (i32, i32, i32, i32) {
    %c0_i32 = arith.constant 0 : i32
    %c0_i32_0 = arith.constant 0 : i32
    %c0_i32_1 = arith.constant 0 : i32
    %c0_i32_2 = arith.constant 0 : i32
    return %arg0, %c0_i32, %c0_i32_0, %c0_i32_1 : i32, i32, i32, i32
  }
}

</mosaic_0001>

<bundles_post_ra>
// kernel: tpu_custom_call.1
= control target key start
LH: loop header
LB: loop body
LE: loop exit
PB: predicated region body
PF: predicated region fallthrough
CT: control target
= control target key end

     0   :  { %11 = vsyncpa [#allocation6], 0  ;;  %s1505_s0 = inlined_call_operand.vmem [shape: f32[6,4], index: 0, kind: input, shape index: {}]   ;;  %s1506_s1 = inlined_call_operand.hbm [shape: f32[2,8,8,128], index: 1, kind: input, shape index: {}]   ;;  %s1507_s2 = inlined_call_operand.hbm [shape: f32[2,5,8,128], index: 2, kind: input, shape index: {}]   ;;  %s1508_s3 = inlined_call_operand.hbm [shape: f32[2,2,8,128], index: 3, kind: input, shape index: {}]   ;;  %s1509_s4 = inlined_call_operand.hbm [shape: f32[2,2,8,128], index: 4, kind: output, shape index: {0}]   ;;  %s1510_s5 = inlined_call_operand.hbm [shape: f32[2,4,8,128], index: 5, kind: output, shape index: {1}]  }
   0x1   :  { %12 = vsyncpa [#allocation4], 0 }
   0x2   :  { %13 = vsyncpa [#allocation9], 0 }
   0x3   :  { %14 = vsyncpa [#allocation5], 0 }
   0x4   :  { %15 = vsyncpa [#allocation13], 0  ;;  %s42_s20 = sshll.u32 %s1507_s2, 4  ;;  %s994_s21 = smov [#allocation8]   ;;  %s43_s20 = int_to_ptr.hbm [resolvable:$true] %s42_s20 }
   0x5   :  { %s44_s22 = sshll.u32 %s994_s21, 4  ;;  %s21_s25 = sshll.u32 %s1505_s0, 4  ;;  %s45_s22 = int_to_ptr.vmem [resolvable:$true] %s44_s22  ;;  %s22_s25 = int_to_ptr.vmem [resolvable:$true] %s21_s25 }
   0x6   :  { %s995_s26 = smov 128   ;;  %s996_s27 = smov 8  }
   0x7   :  { %50 = dma.hbm_to_vmem [thread:$0]  %s43_s20, 1280, %s45_s22, [#allocation9], %s995_s26, %s995_s26, %s996_s27  }
   0x8   :  { %s997_s28 = smov [#allocation3]   ;;  %s29_s2 = sshll.u32 %s1506_s1, 4  ;;  %s30_s2 = int_to_ptr.hbm [resolvable:$true] %s29_s2 }
   0x9   :  { %24 = dma.vmem_to_smem %s22_s25, 128, %s997_s28, [#allocation6]  }
   0xa   :  { %s998_s6 = smov [#allocation7]   ;;  %s55_s0 = sshll.u32 %s1508_s3, 4  ;;  %s56_s0 = int_to_ptr.hbm [resolvable:$true] %s55_s0 }
   0xb   :  { %s31_s7 = sshll.u32 %s998_s6, 4  ;;  %s999_s10 = smov [#allocation10]   ;;  %s32_s7 = int_to_ptr.vmem [resolvable:$true] %s31_s7 }
   0xc   :  { %37 = dma.hbm_to_vmem [thread:$0]  %s30_s2, 2048, %s32_s7, [#allocation4], %s995_s26, %s995_s26, %s996_s27  }
   0xd   :  { %s57_s11 = sshll.u32 %s999_s10, 4  ;;  %s58_s11 = int_to_ptr.vmem [resolvable:$true] %s57_s11 }
   0xe   :  { %63 = dma.hbm_to_vmem [thread:$0]  %s56_s0, 512, %s58_s11, [#allocation9], %s995_s26, %s995_s26, %s996_s27  }
   0xf   :  { %984 = dma.done.wait [#allocation6], 128  }
  0x10   :  { %985 = vsyncadd [#allocation6], 4294967168 }
  0x11   :  { %986 = dma.done.wait [#allocation4], 2048  }
  0x12   :  { %987 = vsyncadd [#allocation4], 4294965248 }
  0x13   :  { %988 = dma.done.wait [#allocation9], 1792  }
  0x14   :  { %989 = vsyncadd [#allocation9], 4294965504 }
  0x15   :  { %80 = sfence }
  0x16   :  { %v1053_v0 = vld [vmem:[#allocation10] sm:$0xff]  ;;  %v1055_v1 = vld [vmem:[#allocation10 + $0x8] sm:$0xff]  ;;  %v1057_v2 = vld [vmem:[#allocation7] sm:$0xff]  ;;  %s1000_s1 = smov [#allocation12]   ;;  %s777_s14 = sshll.u32 %s1510_s5, 4  ;;  %s778_s14 = int_to_ptr.hbm [resolvable:$true] %s777_s14 }
  0x17   :  { %v123_v3 = vmul.f32 %v1053_v0, %v1053_v0  ;;  %v124_v4 = vmul.f32 %v1055_v1, %v1055_v1  ;;  %v1063_v5 = vld [vmem:[#allocation7 + $0x8] sm:$0xff]  ;;  %v1065_v6 = vld [vmem:[#allocation7 + $0x10] sm:$0xff]  ;;  %v1067_v7 = vld [vmem:[#allocation7 + $0x18] sm:$0xff]  ;;  %s775_s3 = sshll.u32 %s1000_s1, 4  ;;  %s1232_s5 = sld [smem:[#allocation3]]  ;;  %s776_s3 = int_to_ptr.vmem [resolvable:$true] %s775_s3 }
  0x18   :  { %v1069_v8 = vld [vmem:[#allocation7 + $0x20] sm:$0xff]  ;;  %v1071_v9 = vld [vmem:[#allocation7 + $0x28] sm:$0xff]  ;;  %v1073_v10 = vld [vmem:[#allocation7 + $0x30] sm:$0xff]  ;;  %s1236_s15 = sld [smem:[#allocation3 + $0x80]] }
  0x19   :  { %v125_v11 = vadd.f32 %v124_v4, %v123_v3  ;;  %v1075_v12 = vld [vmem:[#allocation7 + $0x38] sm:$0xff]  ;;  %v1077_v13 = vld [vmem:[#allocation10 + $0x10] sm:$0xff]  ;;  %v1079_v14 = vld [vmem:[#allocation10 + $0x18] sm:$0xff]  ;;  %s1238_s16 = sld [smem:[#allocation3 + $0x100]] }
  0x1a   :  { %v461_v15 = vmul.f32 %v1077_v13, %v1077_v13  ;;  %v462_v16 = vmul.f32 %v1079_v14, %v1079_v14  ;;  %s1245_s17 = sld [smem:[#allocation3 + $0x180]] }
  0x1b   :  { %v127_v17 = vmul.f32 %v1057_v2, %v125_v11  ;;  %v137_v18 = vmul.f32 %v1063_v5, %v125_v11  ;;  %v147_v19 = vmul.f32 %v1065_v6, %v125_v11  ;;  %v157_v20 = vmul.f32 %v1067_v7, %v125_v11  ;;  %s1247_s18 = sld [smem:[#allocation3 + $0x200]] }
  0x1c   :  { %v167_v21 = vmul.f32 %v1069_v8, %v125_v11  ;;  %v177_v22 = vmul.f32 %v1071_v9, %v125_v11  ;;  %v187_v23 = vmul.f32 %v1073_v10, %v125_v11  ;;  %v197_v24 = vmul.f32 %v1075_v12, %v125_v11  ;;  %s1249_s19 = sld [smem:[#allocation3 + $0x280]] }
  0x1d   :  { %v128_v25 = vrot.slane %v127_v17, 4  ;;  %v138_v26 = vrot.slane %v137_v18, 4  ;;  %v148_v27 = vrot.slane %v147_v19, 4  ;;  %v158_v28 = vrot.slane %v157_v20, 4  ;;  %s1252_s20 = sld [smem:[#allocation3 + $0x1]] }
  0x1e   :  { %v168_v29 = vrot.slane %v167_v21, 4  ;;  %v178_v30 = vrot.slane %v177_v22, 4  ;;  %v188_v31 = vrot.slane %v187_v23, 4  ;;  %v198_v32 = vrot.slane %v197_v24, 4  ;;  %s1259_s21 = sld [smem:[#allocation3 + $0x81]] }
  0x1f   :  { %v129_v33 = vadd.f32 %v128_v25, %v127_v17  ;;  %v139_v34 = vadd.f32 %v138_v26, %v137_v18  ;;  %v149_v35 = vadd.f32 %v148_v27, %v147_v19  ;;  %v159_v36 = vadd.f32 %v158_v28, %v157_v20  ;;  %v1093_v18 = vld [vmem:[#allocation7 + $0x40] sm:$0xff]  ;;  %v1095_v19 = vld [vmem:[#allocation7 + $0x48] sm:$0xff]  ;;  %v1105_v27 = vld [vmem:[#allocation7 + $0x70] sm:$0xff]  ;;  %s1263_s22 = sld [smem:[#allocation3 + $0x101]] }
  0x20   :  { %v169_v37 = vadd.f32 %v168_v29, %v167_v21  ;;  %v179_v38 = vadd.f32 %v178_v30, %v177_v22  ;;  %v189_v39 = vadd.f32 %v188_v31, %v187_v23  ;;  %v199_v40 = vadd.f32 %v198_v32, %v197_v24  ;;  %v1097_v21 = vld [vmem:[#allocation7 + $0x50] sm:$0xff]  ;;  %v1099_v22 = vld [vmem:[#allocation7 + $0x58] sm:$0xff]  ;;  %v1101_v23 = vld [vmem:[#allocation7 + $0x60] sm:$0xff]  ;;  %s1265_s23 = sld [smem:[#allocation3 + $0x181]] }
  0x21   :  { %v130_v41 = vrot.slane %v129_v33, 2  ;;  %v140_v42 = vrot.slane %v139_v34, 2  ;;  %v150_v43 = vrot.slane %v149_v35, 2  ;;  %v160_v44 = vrot.slane %v159_v36, 2  ;;  %v1103_v26 = vld [vmem:[#allocation7 + $0x68] sm:$0xff]  ;;  %v1107_v28 = vld [vmem:[#allocation7 + $0x78] sm:$0xff] }
  0x22   :  { %v170_v45 = vrot.slane %v169_v37, 2  ;;  %v180_v46 = vrot.slane %v179_v38, 2  ;;  %v190_v47 = vrot.slane %v189_v39, 2  ;;  %v200_v48 = vrot.slane %v199_v40, 2  ;;  %s1267_s24 = sld [smem:[#allocation3 + $0x201]] }
  0x23   :  { %v131_v49 = vadd.f32 %v130_v41, %v129_v33  ;;  %v141_v50 = vadd.f32 %v140_v42, %v139_v34  ;;  %v151_v51 = vadd.f32 %v150_v43, %v149_v35  ;;  %v161_v52 = vadd.f32 %v160_v44, %v159_v36  ;;  %s1271_s25 = sld [smem:[#allocation3 + $0x281]] }
  0x24   :  { %v171_v53 = vadd.f32 %v170_v45, %v169_v37  ;;  %v181_v54 = vadd.f32 %v180_v46, %v179_v38  ;;  %v191_v55 = vadd.f32 %v190_v47, %v189_v39  ;;  %v201_v56 = vadd.f32 %v200_v48, %v199_v40  ;;  %s1274_s28 = sld [smem:[#allocation3 + $0x2]] }
  0x25   :  { %v132_v57 = vrot.slane %v131_v49, 1  ;;  %v142_v58 = vrot.slane %v141_v50, 1  ;;  %v152_v59 = vrot.slane %v151_v51, 1  ;;  %v162_v60 = vrot.slane %v161_v52, 1  ;;  %s1276_s29 = sld [smem:[#allocation3 + $0x82]] }
  0x26   :  { %v172_v61 = vrot.slane %v171_v53, 1  ;;  %v182_v62 = vrot.slane %v181_v54, 1  ;;  %v192_v63 = vrot.slane %v191_v55, 1  ;;  %v202_v3 = vrot.slane %v201_v56, 1  ;;  %s1278_s30 = sld [smem:[#allocation3 + $0x102]] }
  0x27   :  { %v133_v4 = vadd.f32 %v132_v57, %v131_v49  ;;  %v143_v11 = vadd.f32 %v142_v58, %v141_v50  ;;  %v153_v17 = vadd.f32 %v152_v59, %v151_v51  ;;  %v163_v20 = vadd.f32 %v162_v60, %v161_v52  ;;  %s1281_s2 = sld [smem:[#allocation3 + $0x182]] }
  0x28   :  { %v173_v24 = vadd.f32 %v172_v61, %v171_v53  ;;  %v463_v25 = vadd.f32 %v462_v16, %v461_v15  ;;  %v183_v29 = vadd.f32 %v182_v62, %v181_v54  ;;  %v193_v30 = vadd.f32 %v192_v63, %v191_v55  ;;  %s1284_s6 = sld [smem:[#allocation3 + $0x3]] }
  0x29   :  { %134 = vst [vmem:[#allocation2] sm:$0x1] %v133_v4  ;;  %v203_v31 = vadd.f32 %v202_v3, %v201_v56  ;;  %s1286_s7 = sld [smem:[#allocation3 + $0x83]] }
  0x2a   :  { %144 = vst [vmem:[#allocation2 + $0x1] sm:$0x1] %v143_v11  ;;  %v466_v32 = vmul.f32 %v1093_v18, %v463_v25  ;;  %v476_v33 = vmul.f32 %v1095_v19, %v463_v25  ;;  %v486_v34 = vmul.f32 %v1097_v21, %v463_v25  ;;  %v496_v35 = vmul.f32 %v1099_v22, %v463_v25  ;;  %s1288_s8 = sld [smem:[#allocation3 + $0x202]] }
  0x2b   :  { %154 = vst [vmem:[#allocation2 + $0x2] sm:$0x1] %v153_v17  ;;  %v506_v15 = vmul.f32 %v1101_v23, %v463_v25  ;;  %v516_v16 = vmul.f32 %v1103_v26, %v463_v25  ;;  %v526_v36 = vmul.f32 %v1105_v27, %v463_v25  ;;  %v536_v37 = vmul.f32 %v1107_v28, %v463_v25  ;;  %s1290_s9 = sld [smem:[#allocation3 + $0x103]] }
  0x2c   :  { %164 = vst [vmem:[#allocation2 + $0x3] sm:$0x1] %v163_v20  ;;  %v467_v38 = vrot.slane %v466_v32, 4  ;;  %v477_v39 = vrot.slane %v476_v33, 4  ;;  %v487_v40 = vrot.slane %v486_v34, 4  ;;  %v497_v41 = vrot.slane %v496_v35, 4 }
  0x2d   :  { %174 = vst [vmem:[#allocation2 + $0x4] sm:$0x1] %v173_v24  ;;  %v507_v42 = vrot.slane %v506_v15, 4  ;;  %v517_v43 = vrot.slane %v516_v16, 4  ;;  %v527_v44 = vrot.slane %v526_v36, 4  ;;  %v537_v45 = vrot.slane %v536_v37, 4 }
  0x2e   :  { %184 = vst [vmem:[#allocation2 + $0x5] sm:$0x1] %v183_v29  ;;  %v468_v46 = vadd.f32 %v467_v38, %v466_v32  ;;  %v478_v47 = vadd.f32 %v477_v39, %v476_v33  ;;  %v488_v48 = vadd.f32 %v487_v40, %v486_v34  ;;  %v498_v49 = vadd.f32 %v497_v41, %v496_v35  ;;  %v109_v34 = vld [vmem:[#allocation8 + $0x10] sm:$0xff]  ;;  %s1294_s0 = sld [smem:[#allocation3 + $0x183]] }
  0x2f   :  { %194 = vst [vmem:[#allocation2 + $0x6] sm:$0x1] %v193_v30  ;;  %v508_v50 = vadd.f32 %v507_v42, %v506_v15  ;;  %v518_v51 = vadd.f32 %v517_v43, %v516_v16  ;;  %v528_v52 = vadd.f32 %v527_v44, %v526_v36  ;;  %v538_v53 = vadd.f32 %v537_v45, %v536_v37  ;;  %v1117_v45 = vld [vmem:[#allocation8] sm:$0xff]  ;;  %s1297_s10 = sld [smem:[#allocation3 + $0x282]] }
  0x30   :  { %204 = vst [vmem:[#allocation2 + $0x7] sm:$0x1] %v203_v31  ;;  %v469_v54 = vrot.slane %v468_v46, 2  ;;  %v479_v55 = vrot.slane %v478_v47, 2  ;;  %v489_v56 = vrot.slane %v488_v48, 2  ;;  %v499_v57 = vrot.slane %v498_v49, 2 }
  0x31   :  { %v509_v58 = vrot.slane %v508_v50, 2  ;;  %v519_v59 = vrot.slane %v518_v51, 2  ;;  %v529_v60 = vrot.slane %v528_v52, 2  ;;  %v539_v61 = vrot.slane %v538_v53, 2  ;;  %s1385_s11 = sld [smem:[#allocation3 + $0x203]] }
  0x32   :  { %v470_v62 = vadd.f32 %v469_v54, %v468_v46  ;;  %v480_v63 = vadd.f32 %v479_v55, %v478_v47  ;;  %v490_v3 = vadd.f32 %v489_v56, %v488_v48  ;;  %v500_v4 = vadd.f32 %v499_v57, %v498_v49  ;;  %v1119_v46 = vld [vmem:[#allocation8 + $0x8] sm:$0xff]  ;;  %v446_v56 = vld [vmem:[#allocation8 + $0x38] sm:$0xff]  ;;  %s1389_s1 = sld [smem:[#allocation3 + $0x283]] }
  0x33   :  { %v510_v11 = vadd.f32 %v509_v58, %v508_v50  ;;  %v520_v17 = vadd.f32 %v519_v59, %v518_v51  ;;  %v530_v20 = vadd.f32 %v529_v60, %v528_v52  ;;  %v540_v24 = vadd.f32 %v539_v61, %v538_v53 }
  0x34   :  { %v471_v25 = vrot.slane %v470_v62, 1  ;;  %v481_v29 = vrot.slane %v480_v63, 1  ;;  %v491_v30 = vrot.slane %v490_v3, 1  ;;  %v501_v31 = vrot.slane %v500_v4, 1 }
  0x35   :  { %v511_v32 = vrot.slane %v510_v11, 1  ;;  %v521_v33 = vrot.slane %v520_v17, 1  ;;  %v531_v37 = vrot.slane %v530_v20, 1  ;;  %v541_v39 = vrot.slane %v540_v24, 1 }
  0x36   :  { %v472_v15 = vadd.f32 %v471_v25, %v470_v62  ;;  %v482_v16 = vadd.f32 %v481_v29, %v480_v63  ;;  %v492_v36 = vadd.f32 %v491_v30, %v490_v3  ;;  %v502_v38 = vadd.f32 %v501_v31, %v500_v4  ;;  %v1129_v4 = vld [vmem:[#allocation8 + $0x28] sm:$0xff] }
  0x37   :  { %v205_v35 = vld [vmem:[#allocation2] sm:$0xff]  ;;  %v512_v40 = vadd.f32 %v511_v32, %v510_v11  ;;  %v522_v42 = vadd.f32 %v521_v33, %v520_v17  ;;  %v532_v43 = vadd.f32 %v531_v37, %v530_v20  ;;  %v542_v44 = vadd.f32 %v541_v39, %v540_v24 }
  0x38   :  { %473 = vst [vmem:[#allocation2] sm:$0x1] %v472_v15  ;;  %v206_v41 = vadd.f32 %v205_v35, %v109_v34  ;;  %v117_v47 = vmul.f32 %v1053_v0, %v1117_v45  ;;  %v118_v48 = vmul.f32 %v1055_v1, %v1119_v46  ;;  %v120_v49 = vmul.f32 %v1055_v1, %v1117_v45 }
  0x39   :  { %483 = vst [vmem:[#allocation2 + $0x1] sm:$0x1] %v482_v16  ;;  %v121_v50 = vmul.f32 %v1053_v0, %v1119_v46  ;;  %v1131_v0 = vld [vmem:[#allocation8 + $0x30] sm:$0xff]  ;;  %v455_v24 = vmul.f32 %v1077_v13, %v1129_v4  ;;  %v458_v29 = vmul.f32 %v1079_v14, %v1129_v4 }
  0x3a   :  { %493 = vst [vmem:[#allocation2 + $0x2] sm:$0x1] %v492_v36  ;;  %828 = vrcp.f32 %v206_v41  ;;  %v119_v53 = vsub.f32 %v117_v47, %v118_v48  ;;  %v456_v25 = vmul.f32 %v1079_v14, %v1131_v0  ;;  %v459_v30 = vmul.f32 %v1077_v13, %v1131_v0 }
  0x3b   :  { %503 = vst [vmem:[#allocation2 + $0x3] sm:$0x1] %v502_v38  ;;  %v122_v55 = vadd.f32 %v121_v50, %v120_v49 }
  0x3c   :  { %513 = vst [vmem:[#allocation2 + $0x4] sm:$0x1] %v512_v40  ;;  %v457_v15 = vsub.f32 %v455_v24, %v456_v25  ;;  %v460_v36 = vadd.f32 %v459_v30, %v458_v29 }
  0x3d   :  { %523 = vst [vmem:[#allocation2 + $0x5] sm:$0x1] %v522_v42 }
  0x3e   :  { %533 = vst [vmem:[#allocation2 + $0x6] sm:$0x1] %v532_v43 }
  0x3f   :  { %543 = vst [vmem:[#allocation2 + $0x7] sm:$0x1] %v542_v44 }
  0x40   :  { %v829_v51 = vpop.eup %828 }
  0x41   :  { %v208_v52 = vmul.f32 %v829_v51, %v206_v41 }
  0x43   :  { %v209_v54 = vsub.f32 2.0, %v208_v52 }
  0x45   :  { %v210_v57 = vmul.f32 %v829_v51, %v209_v54 }
  0x46   :  { %v544_v58 = vld [vmem:[#allocation2] sm:$0xff] }
  0x47   :  { %v211_v59 = vmul.f32 %v210_v57, %v119_v53  ;;  %v212_v60 = vmul.f32 %v210_v57, %v122_v55  ;;  %v545_v61 = vadd.f32 %v544_v58, %v446_v56 }
  0x49   :  { %213 = vst [vmem:[#allocation12] sm:$0xff] %v211_v59  ;;  %830 = vrcp.f32 %v545_v61  ;;  %v216_v62 = vmul.f32 %v211_v59, %v119_v53  ;;  %v217_v63 = vmul.f32 %v212_v60, %v122_v55  ;;  %v220_v3 = vmul.f32 %v211_v59, %v122_v55 }
  0x4a   :  { %215 = vst [vmem:[#allocation12 + $0x8] sm:$0xff] %v212_v60  ;;  %v221_v1 = vmul.f32 %v212_v60, %v119_v53  ;;  %v236_v49 = vmul.f32 %v211_v59, %v1117_v45  ;;  %v237_v50 = vmul.f32 %v212_v60, %v1119_v46  ;;  %v239_v53 = vmul.f32 %v212_v60, %v1117_v45 }
  0x4b   :  { %v218_v11 = vadd.f32 %v217_v63, %v216_v62  ;;  %v240_v54 = vmul.f32 %v211_v59, %v1119_v46 }
  0x4c   :  { %v222_v17 = vsub.f32 %v220_v3, %v221_v1  ;;  %v238_v62 = vadd.f32 %v237_v50, %v236_v49  ;;  %v258_v3 = vmul.f32 %v211_v59, %v211_v59  ;;  %v259_v1 = vmul.f32 %v212_v60, %v212_v60 }
  0x4d   :  { %v219_v20 = vsub.f32 1.0, %v218_v11  ;;  %v241_v24 = vsub.f32 %v239_v53, %v240_v54 }
  0x4e   :  { %v224_v33 = vmul.f32 %v222_v17, %v222_v17  ;;  %v260_v59 = vadd.f32 %v259_v1, %v258_v3 }
  0x4f   :  { %v831_v31 = vpop.eup %830  ;;  %v223_v32 = vmul.f32 %v219_v20, %v219_v20 }
  0x50   :  { %v547_v34 = vmul.f32 %v831_v31, %v545_v61 }
  0x51   :  { %v225_v35 = vadd.f32 %v224_v33, %v223_v32 }
  0x52   :  { %v548_v16 = vsub.f32 2.0, %v547_v34 }
  0x53   :  { %832 = vrcp.f32 %v225_v35  ;;  %vm254_vm1 = vweird.f32 %v225_v35 }
  0x54   :  { %v549_v37 = vmul.f32 %v831_v31, %v548_v16  ;;  %834 = vrsqrt.f32 %v225_v35 }
  0x56   :  { %v1141_v38 = vmul.f32 %v549_v37, %v457_v15  ;;  %v1143_v39 = vmul.f32 %v549_v37, %v460_v36 }
  0x58   :  { %553 = vst [vmem:[#allocation12 + $0x20] sm:$0xff] %v1141_v38  ;;  %v556_v14 = vmul.f32 %v1141_v38, %v457_v15  ;;  %v557_v13 = vmul.f32 %v1143_v39, %v460_v36  ;;  %v560_v40 = vmul.f32 %v1141_v38, %v460_v36  ;;  %v561_v41 = vmul.f32 %v1143_v39, %v457_v15 }
  0x59   :  { %v833_v42 = vpop.eup %832  ;;  %555 = vst [vmem:[#allocation12 + $0x28] sm:$0xff] %v1143_v39  ;;  %v579_v49 = vmul.f32 %v1143_v39, %v1129_v4 }
  0x5a   :  { %v835_v43 = vpop.eup %834  ;;  %v227_v44 = vmul.f32 %v833_v42, %v225_v35  ;;  %v558_v47 = vadd.f32 %v557_v13, %v556_v14  ;;  %v1151_v48 = vsub.f32 %v560_v40, %v561_v41 }
  0x5b   :  { %v249_v51 = vmul.f32 %v835_v43, %v225_v35  ;;  %vm255_vm0 = vweird.f32 %v835_v43 }
  0x5c   :  { %v228_v52 = vsub.f32 2.0, %v227_v44  ;;  %v1157_v55 = vsub.f32 1.0, %v558_v47  ;;  %v564_v61 = vmul.f32 %v1151_v48, %v1151_v48  ;;  %vm256_vm2 = vmor %vm254_vm1, %vm255_vm0  ;;  %v577_v44 = vmul.f32 %v1143_v39, %v1131_v0 }
  0x5d   :  { %v250_v56 = vmul.f32 %v835_v43, %v249_v51 }
  0x5e   :  { %v229_v57 = vmul.f32 %v833_v42, %v228_v52  ;;  %v563_v58 = vmul.f32 %v1157_v55, %v1157_v55  ;;  %v580_v52 = vmul.f32 %v1141_v38, %v1131_v0 }
  0x5f   :  { %v251_v63 = vmul.f32 0.5, %v250_v56 }
  0x60   :  { %v230_v11 = vmul.f32 %v229_v57, %v219_v20  ;;  %v231_v25 = vmul.f32 %v229_v57, %v222_v17  ;;  %v1163_v45 = vadd.f32 %v564_v61, %v563_v58  ;;  %v581_v3 = vsub.f32 %v579_v49, %v580_v52 }
  0x61   :  { %v252_v46 = vsub.f32 1.5, %v251_v63 }
  0x62   :  { %233 = vst [vmem:[#allocation12 + $0x10] sm:$0xff] %v230_v11  ;;  %v242_v29 = vmul.f32 %v238_v62, %v230_v11  ;;  %v246_v30 = vmul.f32 %v241_v24, %v230_v11  ;;  %v243_v31 = vmul.f32 %v241_v24, %v231_v25  ;;  %v245_v32 = vmul.f32 %v238_v62, %v231_v25 }
  0x63   :  { %v253_v33 = vmul.f32 %v835_v43, %v252_v46  ;;  %235 = vst [vmem:[#allocation12 + $0x18] sm:$0xff] %v231_v25  ;;  %836 = vrcp.f32 %v1163_v45  ;;  %v598_v62 = vmul.f32 %v1141_v38, %v1141_v38  ;;  %vm594_vm4 = vweird.f32 %v1163_v45 }
  0x64   :  { %v1166_v60 = vsub.f32 %v242_v29, %v243_v31  ;;  %v1168_v20 = vadd.f32 %v246_v30, %v245_v32  ;;  %838 = vrsqrt.f32 %v1163_v45 }
  0x65   :  { %v257_v17 = vsel %vm256_vm2, %v835_v43, %v253_v33  ;;  %v576_v43 = vmul.f32 %v1141_v38, %v1129_v4 }
  0x66   :  { %v1171_v34 = vmul.f32 %v260_v59, %v257_v17  ;;  %v294_v15 = vmul.f32 %v1166_v60, %v1166_v60  ;;  %v295_v35 = vmul.f32 %v1168_v20, %v1168_v20 }
  0x67   :  { %v578_v58 = vadd.f32 %v577_v44, %v576_v43 }
  0x68   :  { %v263_v16 = vperm.slane %v1171_v34, 0  ;;  %v267_v36 = vperm.slane %v1171_v34, 1  ;;  %v271_v37 = vperm.slane %v1171_v34, 2  ;;  %v1180_v13 = vadd.f32 %v295_v35, %v294_v15 }
  0x69   :  { %v837_v14 = vpop.eup %836  ;;  %v279_v63 = vperm.slane %v1171_v34, 4 }
  0x6a   :  { %v839_v40 = vpop.eup %838  ;;  %v264_v41 = vmul.f32 %v263_v16, %v1057_v2  ;;  %v268_v42 = vmul.f32 %v267_v36, %v1063_v5  ;;  %840 = vrsqrt.f32 %v1180_v13  ;;  %v567_v47 = vmul.f32 %v837_v14, %v1163_v45 }
  0x6b   :  { %v589_v50 = vmul.f32 %v839_v40, %v1163_v45  ;;  %v272_v2 = vmul.f32 %v271_v37, %v1065_v6  ;;  %v275_v5 = vperm.slane %v1171_v34, 3  ;;  %v599_v6 = vmul.f32 %v1143_v39, %v1143_v39 }
  0x6c   :  { %v269_v51 = vadd.f32 %v268_v42, %v264_v41  ;;  %v568_v53 = vsub.f32 2.0, %v567_v47  ;;  %vm595_vm3 = vweird.f32 %v839_v40  ;;  %v287_v16 = vperm.slane %v1171_v34, 6 }
  0x6d   :  { %v590_v54 = vmul.f32 %v839_v40, %v589_v50  ;;  %v276_v4 = vmul.f32 %v275_v5, %v1067_v7  ;;  %vm596_vm5 = vmor %vm594_vm4, %vm595_vm3  ;;  %v600_v31 = vadd.f32 %v599_v6, %v598_v62  ;;  %vm304_vm6 = vcmp.eq.f32.partialorder %v1180_v13, inf }
  0x6e   :  { %v273_v56 = vadd.f32 %v272_v2, %v269_v51  ;;  %v569_v57 = vmul.f32 %v837_v14, %v568_v53  ;;  %v288_v51 = vmul.f32 %v287_v16, %v1073_v10  ;;  %v291_v2 = vperm.slane %v1171_v34, 7  ;;  %v113_v10 = vld [vmem:[#allocation8 + $0x20] sm:$0xff] }
  0x6f   :  { %v591_v61 = vmul.f32 0.5, %v590_v54  ;;  %vm306_vm7 = vcmp.eq.f32.partialorder %v1180_v13, 0.0 }
  0x70   :  { %v841_v1 = vpop.eup %840  ;;  %v570_v0 = vmul.f32 %v569_v57, %v1157_v55  ;;  %v571_v24 = vmul.f32 %v569_v57, %v1151_v48  ;;  %v277_v25 = vadd.f32 %v276_v4, %v273_v56  ;;  %v280_v48 = vmul.f32 %v279_v63, %v1069_v8 }
  0x71   :  { %v592_v11 = vsub.f32 1.5, %v591_v61  ;;  %v298_v38 = vmul.f32 %v841_v1, %v1180_v13  ;;  %v283_v55 = vperm.slane %v1171_v34, 5  ;;  %v292_v56 = vmul.f32 %v291_v2, %v1075_v12 }
  0x72   :  { %573 = vst [vmem:[#allocation12 + $0x30] sm:$0xff] %v570_v0  ;;  %v582_v7 = vmul.f32 %v578_v58, %v570_v0  ;;  %v586_v46 = vmul.f32 %v581_v3, %v570_v0  ;;  %v583_v30 = vmul.f32 %v581_v3, %v571_v24  ;;  %v585_v39 = vmul.f32 %v578_v58, %v571_v24 }
  0x73   :  { %v593_v29 = vmul.f32 %v839_v40, %v592_v11  ;;  %575 = vst [vmem:[#allocation12 + $0x38] sm:$0xff] %v571_v24  ;;  %v299_v32 = vmul.f32 %v841_v1, %v298_v38  ;;  %v281_v35 = vadd.f32 %v280_v48, %v277_v25  ;;  %v284_v41 = vmul.f32 %v283_v55, %v1071_v9 }
  0x74   :  { %v1212_v33 = vsub.f32 %v582_v7, %v583_v30  ;;  %v1216_v17 = vadd.f32 %v586_v46, %v585_v39  ;;  %783 = dma.vmem_to_hbm [thread:$0]  %s776_s3, 1024, %s778_s14, [#allocation13], %s995_s26, %s995_s26, %s996_s27  }
  0x75   :  { %v597_v45 = vsel %vm596_vm5, %v839_v40, %v593_v29  ;;  %v300_v8 = vmul.f32 0.5, %v299_v32  ;;  %v285_v47 = vadd.f32 %v284_v41, %v281_v35  ;;  %v317_v30 = vstv %s1232_s5  ;;  %s1001_s3 = smov [#allocation11]   ;;  %s764_s5 = sshll.u32 %s1509_s4, 4  ;;  %s765_s5 = int_to_ptr.hbm [resolvable:$true] %s764_s5 }
  0x76   :  { %v1214_v59 = vmul.f32 %v600_v31, %v597_v45  ;;  %v634_v15 = vmul.f32 %v1212_v33, %v1212_v33  ;;  %v635_v40 = vmul.f32 %v1216_v17, %v1216_v17  ;;  %v319_v31 = vstv %s1238_s16  ;;  %v450_v45 = vld [vmem:[#allocation8 + $0x48] sm:$0xff]  ;;  %s762_s12 = sshll.u32 %s1001_s3, 4  ;;  %s763_s12 = int_to_ptr.vmem [resolvable:$true] %s762_s12 }
  0x77   :  { %v301_v49 = vsub.f32 1.5, %v300_v8  ;;  %v289_v52 = vadd.f32 %v288_v51, %v285_v47  ;;  %v321_v39 = vstv %s1236_s15  ;;  %v323_v55 = vstv %s1245_s17 }
  0x78   :  { %v603_v36 = vperm.slane %v1214_v59, 0  ;;  %v607_v37 = vperm.slane %v1214_v59, 1  ;;  %v611_v14 = vperm.slane %v1214_v59, 2  ;;  %v1234_v44 = vadd.f32 %v635_v40, %v634_v15 }
  0x79   :  { %v619_v54 = vperm.slane %v1214_v59, 4  ;;  %v293_v62 = vadd.f32 %v292_v56, %v289_v52  ;;  %v623_v3 = vperm.slane %v1214_v59, 5  ;;  %v627_v11 = vperm.slane %v1214_v59, 6 }
  0x7a   :  { %v604_v42 = vmul.f32 %v603_v36, %v1093_v18  ;;  %v608_v43 = vmul.f32 %v607_v37, %v1095_v19  ;;  %v612_v9 = vmul.f32 %v611_v14, %v1097_v21  ;;  %v615_v18 = vperm.slane %v1214_v59, 3 }
  0x7b   :  { %842 = vrsqrt.f32 %v1234_v44  ;;  %v302_v19 = vmul.f32 %v841_v1, %v301_v49  ;;  %v307_v21 = vand.u32 2147483648, %v1180_v13  ;;  %v624_v24 = vmul.f32 %v623_v3, %v1103_v26 }
  0x7c   :  { %v609_v50 = vadd.f32 %v608_v43, %v604_v42  ;;  %v616_v34 = vmul.f32 %v615_v18, %v1099_v22  ;;  %v620_v22 = vmul.f32 %v619_v54, %v1101_v23  ;;  %v628_v46 = vmul.f32 %v627_v11, %v1105_v27 }
  0x7d   :  { %v303_v53 = vmul.f32 %v302_v19, %v1180_v13  ;;  %v631_v26 = vperm.slane %v1214_v59, 7  ;;  %v343_v27 = vstv %s1252_s20  ;;  %vm644_vm8 = vcmp.eq.f32.partialorder %v1234_v44, inf }
  0x7e   :  { %v613_v5 = vadd.f32 %v612_v9, %v609_v50  ;;  %v647_v59 = vand.u32 2147483648, %v1234_v44  ;;  %v347_v35 = vstv %s1259_s21  ;;  %vm646_vm9 = vcmp.eq.f32.partialorder %v1234_v44, 0.0 }
  0x7f   :  { %v305_v57 = vsel %vm304_vm6, %v1180_v13, %v303_v53  ;;  %v632_v8 = vmul.f32 %v631_v26, %v1107_v28  ;;  %v369_v37 = vstv %s1274_s28  ;;  %v373_v14 = vstv %s1276_s29 }
  0x80   :  { %v308_v58 = vsel %vm306_vm7, %v307_v21, %v305_v57  ;;  %v617_v63 = vadd.f32 %v616_v34, %v613_v5  ;;  %v395_v41 = vstv %s1284_s6  ;;  %v399_v42 = vstv %s1286_s7 }
  0x81   :  { %v843_v61 = vpop.eup %842  ;;  %v309_v4 = vmul.f32 %v308_v58, %v113_v10  ;;  %v1317_v49 = vstv %s1247_s18  ;;  %v349_v50 = vstv %s1265_s23  ;;  %v371_v51 = vstv %s1278_s30 }
  0x82   :  { %v638_v13 = vmul.f32 %v843_v61, %v1234_v44  ;;  %v621_v1 = vadd.f32 %v620_v22, %v617_v63  ;;  %v375_v2 = vstv %s1281_s2  ;;  %v397_v9 = vstv %s1290_s9 }
  0x83   :  { %v310_v12 = vsub.f32 %v309_v4, %v293_v62  ;;  %v1326_v5 = vstv %s1249_s19  ;;  %v1329_v52 = vstv %s1267_s24  ;;  %v401_v53 = vstv %s1294_s0 }
  0x84   :  { %v639_v0 = vmul.f32 %v843_v61, %v638_v13  ;;  %v625_v38 = vadd.f32 %v624_v24, %v621_v1  ;;  %v1333_v10 = vstv %s1271_s25  ;;  %v1336_v21 = vstv %s1288_s8 }
  0x85   :  { %v311_v6 = vmax.f32 %v310_v12, 0.0  ;;  %v1339_v34 = vstv %s1297_s10 }
  0x86   :  { %v640_v25 = vmul.f32 0.5, %v639_v0  ;;  %v629_v32 = vadd.f32 %v628_v46, %v625_v38 }
  0x87   :  { %v312_v23 = vadd.f32 %v311_v6, %v293_v62 }
  0x88   :  { %v641_v7 = vsub.f32 1.5, %v640_v25  ;;  %v1314_v43 = vadd.f32 %v632_v8, %v629_v32 }
  0x89   :  { %844 = vrcp.f32 %v312_v23 }
  0x8a   :  { %v642_v29 = vmul.f32 %v843_v61, %v641_v7 }
  0x8c   :  { %v643_v48 = vmul.f32 %v642_v29, %v1234_v44 }
  0x8e   :  { %v645_v16 = vsel %vm644_vm8, %v1234_v44, %v643_v48  ;;  %v345_v44 = vstv %s1263_s22 }
  0x8f   :  { %v845_v15 = vpop.eup %844  ;;  %v648_v40 = vsel %vm646_vm9, %v647_v59, %v645_v16 }
  0x90   :  { %v314_v36 = vmul.f32 %v845_v15, %v312_v23  ;;  %v649_v28 = vmul.f32 %v648_v40, %v450_v45 }
  0x92   :  { %v315_v47 = vsub.f32 2.0, %v314_v36  ;;  %v650_v18 = vsub.f32 %v649_v28, %v1314_v43 }
  0x94   :  { %v316_v19 = vmul.f32 %v845_v15, %v315_v47  ;;  %v1341_v54 = vmax.f32 %v650_v18, 0.0 }
  0x96   :  { %v318_v56 = vmul.f32 %v317_v30, %v316_v19  ;;  %v322_v57 = vmul.f32 %v321_v39, %v316_v19  ;;  %v344_v58 = vmul.f32 %v343_v27, %v316_v19  ;;  %v348_v61 = vmul.f32 %v347_v35, %v316_v19 }
  0x97   :  { %v370_v62 = vmul.f32 %v369_v37, %v316_v19  ;;  %v374_v4 = vmul.f32 %v373_v14, %v316_v19  ;;  %v396_v63 = vmul.f32 %v395_v41, %v316_v19  ;;  %v400_v22 = vmul.f32 %v399_v42, %v316_v19 }
  0x98   :  { %v320_v3 = vadd.f32 %v319_v31, %v318_v56  ;;  %v324_v12 = vadd.f32 %v323_v55, %v322_v57  ;;  %v346_v13 = vadd.f32 %v345_v44, %v344_v58  ;;  %v350_v6 = vadd.f32 %v349_v50, %v348_v61 }
  0x99   :  { %v372_v1 = vadd.f32 %v371_v51, %v370_v62  ;;  %v376_v0 = vadd.f32 %v375_v2, %v374_v4  ;;  %v398_v11 = vadd.f32 %v397_v9, %v396_v63  ;;  %v402_v23 = vadd.f32 %v401_v53, %v400_v22 }
  0x9a   :  { %v325_v24 = vmul.f32 %v320_v3, %v1166_v60  ;;  %v326_v25 = vmul.f32 %v324_v12, %v1168_v20  ;;  %v329_v38 = vmul.f32 %v324_v12, %v1166_v60  ;;  %v330_v7 = vmul.f32 %v320_v3, %v1168_v20 }
  0x9b   :  { %v351_v46 = vmul.f32 %v346_v13, %v1166_v60  ;;  %v352_v26 = vmul.f32 %v350_v6, %v1168_v20  ;;  %v355_v29 = vmul.f32 %v350_v6, %v1166_v60  ;;  %v356_v32 = vmul.f32 %v346_v13, %v1168_v20 }
  0x9c   :  { %v327_v48 = vsub.f32 %v325_v24, %v326_v25  ;;  %v331_v45 = vadd.f32 %v330_v7, %v329_v38  ;;  %v377_v59 = vmul.f32 %v372_v1, %v1166_v60  ;;  %v378_v15 = vmul.f32 %v376_v0, %v1168_v20 }
  0x9d   :  { %v353_v8 = vsub.f32 %v351_v46, %v352_v26  ;;  %v357_v16 = vadd.f32 %v356_v32, %v355_v29  ;;  %v381_v36 = vmul.f32 %v376_v0, %v1166_v60  ;;  %v382_v40 = vmul.f32 %v372_v1, %v1168_v20 }
  0x9e   :  { %v328_v28 = vmax.f32 %v327_v48, 0.0  ;;  %v332_v47 = vmax.f32 %v331_v45, 0.0  ;;  %v379_v18 = vsub.f32 %v377_v59, %v378_v15  ;;  %v403_v19 = vmul.f32 %v398_v11, %v1166_v60 }
  0x9f   :  { %v354_v56 = vmax.f32 %v353_v8, 0.0  ;;  %v358_v57 = vmax.f32 %v357_v16, 0.0  ;;  %v383_v58 = vadd.f32 %v382_v40, %v381_v36  ;;  %v404_v61 = vmul.f32 %v402_v23, %v1168_v20 }
  0xa0   :  { %v334_v62 = vmul.f32 %v1317_v49, %v328_v28  ;;  %v336_v4 = vmul.f32 %v1326_v5, %v332_v47  ;;  %v339_v63 = vmul.f32 %v1326_v5, %v328_v28  ;;  %v340_v22 = vmul.f32 %v1317_v49, %v332_v47 }
  0xa1   :  { %v360_v3 = vmul.f32 %v1329_v52, %v354_v56  ;;  %v362_v12 = vmul.f32 %v1333_v10, %v358_v57  ;;  %v365_v13 = vmul.f32 %v1333_v10, %v354_v56  ;;  %v366_v6 = vmul.f32 %v1329_v52, %v358_v57 }
  0xa2   :  { %v337_v1 = vsub.f32 %v334_v62, %v336_v4  ;;  %v341_v0 = vadd.f32 %v340_v22, %v339_v63  ;;  %v380_v24 = vmax.f32 %v379_v18, 0.0  ;;  %v384_v25 = vmax.f32 %v383_v58, 0.0 }
  0xa3   :  { %v363_v38 = vsub.f32 %v360_v3, %v362_v12  ;;  %v367_v7 = vadd.f32 %v366_v6, %v365_v13  ;;  %v405_v46 = vsub.f32 %v403_v19, %v404_v61  ;;  %v407_v26 = vmul.f32 %v402_v23, %v1166_v60 }
  0xa4   :  { %v386_v29 = vmul.f32 %v1336_v21, %v380_v24  ;;  %v388_v32 = vmul.f32 %v1339_v34, %v384_v25  ;;  %v391_v48 = vmul.f32 %v1339_v34, %v380_v24  ;;  %v392_v45 = vmul.f32 %v1336_v21, %v384_v25 }
  0xa5   :  { %v406_v59 = vmax.f32 %v405_v46, 0.0  ;;  %v408_v15 = vmul.f32 %v398_v11, %v1168_v20  ;;  %v1408_v8 = vstv %s1385_s11  ;;  %v1411_v16 = vstv %s1389_s1 }
  0xa6   :  { %v652_v36 = vadd.f32 %v1341_v54, %v1314_v43  ;;  %v364_v40 = vadd.f32 %v363_v38, %v337_v1  ;;  %v368_v60 = vadd.f32 %v367_v7, %v341_v0  ;;  %v389_v28 = vsub.f32 %v386_v29, %v388_v32 }
  0xa7   :  { %v409_v23 = vadd.f32 %v408_v15, %v407_v26  ;;  %v393_v47 = vadd.f32 %v392_v45, %v391_v48  ;;  %v412_v19 = vmul.f32 %v1408_v8, %v406_v59  ;;  %v417_v56 = vmul.f32 %v1411_v16, %v406_v59 }
  0xa8   :  { %846 = vrcp.f32 %v652_v36  ;;  %v390_v57 = vadd.f32 %v389_v28, %v364_v40 }
  0xa9   :  { %v410_v18 = vmax.f32 %v409_v23, 0.0  ;;  %v394_v20 = vadd.f32 %v393_v47, %v368_v60 }
  0xab   :  { %v414_v11 = vmul.f32 %v1411_v16, %v410_v18  ;;  %v418_v43 = vmul.f32 %v1408_v8, %v410_v18 }
  0xad   :  { %v415_v54 = vsub.f32 %v412_v19, %v414_v11  ;;  %v419_v58 = vadd.f32 %v418_v43, %v417_v56 }
  0xae   :  { %v847_v61 = vpop.eup %846 }
  0xaf   :  { %v1419_v62 = vadd.f32 %v415_v54, %v390_v57  ;;  %v1421_v4 = vadd.f32 %v419_v58, %v394_v20  ;;  %v654_v63 = vmul.f32 %v847_v61, %v652_v36 }
  0xb1   :  { %v421_v22 = vmul.f32 %v1419_v62, %v1419_v62  ;;  %v422_v3 = vmul.f32 %v1421_v4, %v1421_v4  ;;  %v655_v12 = vsub.f32 2.0, %v654_v63 }
  0xb3   :  { %v1427_v13 = vadd.f32 %v422_v3, %v421_v22  ;;  %v656_v6 = vmul.f32 %v847_v61, %v655_v12 }
  0xb5   :  { %848 = vrsqrt.f32 %v1427_v13  ;;  %v657_v1 = vmul.f32 %v656_v6, %v317_v30  ;;  %v659_v0 = vmul.f32 %v656_v6, %v321_v39  ;;  %v677_v24 = vmul.f32 %v656_v6, %v343_v27 }
  0xb6   :  { %v679_v25 = vmul.f32 %v656_v6, %v347_v35  ;;  %v697_v38 = vmul.f32 %v656_v6, %v369_v37  ;;  %v699_v7 = vmul.f32 %v656_v6, %v373_v14  ;;  %v717_v29 = vmul.f32 %v656_v6, %v395_v41 }
  0xb7   :  { %v658_v46 = vadd.f32 %v657_v1, %v319_v31  ;;  %v660_v26 = vadd.f32 %v659_v0, %v323_v55  ;;  %v678_v32 = vadd.f32 %v677_v24, %v345_v44  ;;  %v719_v60 = vmul.f32 %v656_v6, %v399_v42 }
  0xb8   :  { %v680_v30 = vadd.f32 %v679_v25, %v349_v50  ;;  %v698_v39 = vadd.f32 %v697_v38, %v371_v51  ;;  %v700_v27 = vadd.f32 %v699_v7, %v375_v2  ;;  %vm430_vm11 = vweird.f32 %v1427_v13  ;;  %v111_v7 = vld [vmem:[#allocation8 + $0x18] sm:$0xff] }
  0xb9   :  { %v661_v35 = vmul.f32 %v658_v46, %v1212_v33  ;;  %v662_v37 = vmul.f32 %v660_v26, %v1216_v17  ;;  %v665_v14 = vmul.f32 %v660_v26, %v1212_v33  ;;  %v666_v31 = vmul.f32 %v658_v46, %v1216_v17 }
  0xba   :  { %v681_v55 = vmul.f32 %v678_v32, %v1212_v33  ;;  %v682_v41 = vmul.f32 %v680_v30, %v1216_v17  ;;  %v685_v44 = vmul.f32 %v680_v30, %v1212_v33  ;;  %v686_v50 = vmul.f32 %v678_v32, %v1216_v17 }
  0xbb   :  { %v849_v51 = vpop.eup %848  ;;  %v663_v48 = vsub.f32 %v661_v35, %v662_v37  ;;  %v667_v2 = vadd.f32 %v666_v31, %v665_v14  ;;  %v701_v45 = vmul.f32 %v698_v39, %v1212_v33  ;;  %v702_v59 = vmul.f32 %v700_v27, %v1216_v17 }
  0xbc   :  { %v425_v15 = vmul.f32 %v849_v51, %v1427_v13  ;;  %v683_v36 = vsub.f32 %v681_v55, %v682_v41  ;;  %v687_v40 = vadd.f32 %v686_v50, %v685_v44  ;;  %v705_v18 = vmul.f32 %v700_v27, %v1212_v33 }
  0xbd   :  { %v664_v23 = vmax.f32 %v663_v48, 0.0  ;;  %v668_v28 = vmax.f32 %v667_v2, 0.0  ;;  %v703_v47 = vsub.f32 %v701_v45, %v702_v59  ;;  %v706_v20 = vmul.f32 %v698_v39, %v1216_v17 }
  0xbe   :  { %v426_v19 = vmul.f32 %v849_v51, %v425_v15  ;;  %v684_v56 = vmax.f32 %v683_v36, 0.0  ;;  %v688_v57 = vmax.f32 %v687_v40, 0.0  ;;  %vm431_vm10 = vweird.f32 %v849_v51 }
  0xbf   :  { %v669_v11 = vmul.f32 %v664_v23, %v1317_v49  ;;  %v670_v43 = vmul.f32 %v668_v28, %v1326_v5  ;;  %v673_v54 = vmul.f32 %v664_v23, %v1326_v5  ;;  %v674_v58 = vmul.f32 %v668_v28, %v1317_v49  ;;  %vm432_vm12 = vmor %vm430_vm11, %vm431_vm10 }
  0xc0   :  { %v427_v42 = vmul.f32 0.5, %v426_v19  ;;  %v689_v61 = vmul.f32 %v684_v56, %v1329_v52  ;;  %v690_v63 = vmul.f32 %v688_v57, %v1333_v10  ;;  %v693_v22 = vmul.f32 %v684_v56, %v1333_v10 }
  0xc1   :  { %v671_v3 = vsub.f32 %v669_v11, %v670_v43  ;;  %v694_v12 = vmul.f32 %v688_v57, %v1329_v52  ;;  %v704_v6 = vmax.f32 %v703_v47, 0.0  ;;  %v707_v24 = vadd.f32 %v706_v20, %v705_v18  ;;  %v448_v57 = vld [vmem:[#allocation8 + $0x40] sm:$0xff] }
  0xc2   :  { %v428_v1 = vsub.f32 1.5, %v427_v42  ;;  %v691_v0 = vsub.f32 %v689_v61, %v690_v63  ;;  %v718_v5 = vadd.f32 %v717_v29, %v397_v9  ;;  %v675_v49 = vadd.f32 %v674_v58, %v673_v54 }
  0xc3   :  { %v695_v25 = vadd.f32 %v694_v12, %v693_v22  ;;  %v720_v38 = vadd.f32 %v719_v60, %v401_v53  ;;  %v708_v26 = vmax.f32 %v707_v24, 0.0  ;;  %v709_v10 = vmul.f32 %v704_v6, %v1336_v21 }
  0xc4   :  { %v429_v46 = vmul.f32 %v849_v51, %v428_v1  ;;  %v721_v32 = vmul.f32 %v718_v5, %v1212_v33  ;;  %v713_v52 = vmul.f32 %v704_v6, %v1339_v34  ;;  %v726_v13 = vmul.f32 %v718_v5, %v1216_v17 }
  0xc5   :  { %v722_v30 = vmul.f32 %v720_v38, %v1216_v17  ;;  %v725_v9 = vmul.f32 %v720_v38, %v1212_v33  ;;  %v692_v39 = vadd.f32 %v691_v0, %v671_v3  ;;  %v710_v53 = vmul.f32 %v708_v26, %v1339_v34 }
  0xc6   :  { %v433_v29 = vsel %vm432_vm12, %v849_v51, %v429_v46  ;;  %v714_v27 = vmul.f32 %v708_v26, %v1336_v21  ;;  %v696_v31 = vadd.f32 %v695_v25, %v675_v49 }
  0xc7   :  { %v434_v35 = vmul.f32 %v433_v29, %v111_v7  ;;  %v723_v37 = vsub.f32 %v721_v32, %v722_v30  ;;  %v727_v14 = vadd.f32 %v726_v13, %v725_v9  ;;  %v711_v55 = vsub.f32 %v709_v10, %v710_v53 }
  0xc8   :  { %v715_v2 = vadd.f32 %v714_v27, %v713_v52 }
  0xc9   :  { %v435_v41 = vmin.f32 %v434_v35, 1.0  ;;  %v724_v44 = vmax.f32 %v723_v37, 0.0  ;;  %v728_v50 = vmax.f32 %v727_v14, 0.0  ;;  %v712_v48 = vadd.f32 %v711_v55, %v692_v39 }
  0xca   :  { %v716_v45 = vadd.f32 %v715_v2, %v696_v31 }
  0xcb   :  { %v436_v33 = vmul.f32 %v435_v41, %v1419_v62  ;;  %v438_v17 = vmul.f32 %v435_v41, %v1421_v4  ;;  %v729_v51 = vmul.f32 %v724_v44, %v1408_v8  ;;  %v730_v34 = vmul.f32 %v728_v50, %v1411_v16 }
  0xcc   :  { %v733_v21 = vmul.f32 %v724_v44, %v1411_v16  ;;  %v734_v59 = vmul.f32 %v728_v50, %v1408_v8 }
  0xcd   :  { %437 = vst [vmem:[#allocation11] sm:$0xff] %v436_v33  ;;  %v731_v15 = vsub.f32 %v729_v51, %v730_v34 }
  0xce   :  { %440 = vst [vmem:[#allocation11 + $0x8] sm:$0xff] %v438_v17  ;;  %v735_v36 = vadd.f32 %v734_v59, %v733_v21 }
  0xcf   :  { %v732_v40 = vadd.f32 %v731_v15, %v712_v48 }
  0xd0   :  { %v736_v60 = vadd.f32 %v735_v36, %v716_v45 }
  0xd1   :  { %v737_v23 = vmul.f32 %v732_v40, %v732_v40 }
  0xd2   :  { %v738_v28 = vmul.f32 %v736_v60, %v736_v60 }
  0xd4   :  { %v739_v62 = vadd.f32 %v738_v28, %v737_v23 }
  0xd6   :  { %850 = vrsqrt.f32 %v739_v62  ;;  %vm746_vm14 = vweird.f32 %v739_v62 }
  0xdc   :  { %v851_v4 = vpop.eup %850 }
  0xdd   :  { %v741_v47 = vmul.f32 %v851_v4, %v739_v62  ;;  %vm747_vm13 = vweird.f32 %v851_v4 }
  0xde   :  { %vm748_vm15 = vmor %vm746_vm14, %vm747_vm13 }
  0xdf   :  { %v742_v18 = vmul.f32 %v851_v4, %v741_v47 }
  0xe1   :  { %v743_v19 = vmul.f32 0.5, %v742_v18 }
  0xe3   :  { %v744_v56 = vsub.f32 1.5, %v743_v19 }
  0xe5   :  { %v745_v16 = vmul.f32 %v851_v4, %v744_v56 }
  0xe7   :  { %v749_v8 = vsel %vm748_vm15, %v851_v4, %v745_v16 }
  0xe8   :  { %v750_v20 = vmul.f32 %v749_v8, %v448_v57 }
  0xea   :  { %v751_v11 = vmin.f32 %v750_v20, 1.0 }
  0xec   :  { %v752_v43 = vmul.f32 %v751_v11, %v732_v40  ;;  %v755_v54 = vmul.f32 %v751_v11, %v736_v60 }
  0xee   :  { %754 = vst [vmem:[#allocation11 + $0x10] sm:$0xff] %v752_v43 }
  0xef   :  { %757 = vst [vmem:[#allocation11 + $0x18] sm:$0xff] %v755_v54 }
  0xf0   :  { %770 = dma.vmem_to_hbm [thread:$0]  %s763_s12, 512, %s765_s5, [#allocation5], %s995_s26, %s995_s26, %s996_s27  }
  0xf1   :  { %990 = dma.done.wait [#allocation5], 512  }
  0xf2   :  { %991 = vsyncadd [#allocation5], 4294966784 }
  0xf3   :  { %992 = dma.done.wait [#allocation13], 1024  }
  0xf4   :  { %993 = vsyncadd [#allocation13], 4294966272 }
  0xf5   :  { %792 = vsyncpa [#allocation4], 1 }
  0xf6   :  { %793 = vsyncpa [#allocation9], 1 }
  0xf7   :  { %794 = vsyncpa [#allocation5], 1 }
  0xf8   :  { %795 = vsyncpa [#allocation13], 1 }
  0xf9   :  { %796 = vsyncpa [#allocation6], 1 }

</bundles_post_ra>
